<compile_context>
chip_gen: v5e
topology: v5e:2x2
jax: 0.10.0
libtpu: 0.0.40
codegen_flags: <defaults>
</compile_context>

<pallas_src>
import functools

import jax
import jax.numpy as jnp
from jax.experimental import pallas as pl
from jax.experimental.pallas import tpu as pltpu


def _convgru_kernel(xhpad_ref, h_ref, w1_ref, w2_ref, b_ref, out_ref, rhpad,
                    *, K, H, W, Cx, Ch, block_B):
    p = K // 2
    WCh = W * Ch
    M = block_B * H

    def row_slices(ref, ky):
        # Stack the ky-shifted (H, lanes) slices of all block_B images along
        # the row (M) axis.  Wide, lane-dense slices; only K of them per pass.
        parts = [ref[b, ky:ky + H, :] for b in range(block_B)]
        return parts[0] if block_B == 1 else jnp.concatenate(parts, axis=0)

    # ---- pass 1: fused [z | r | q_x] via banded-weight conv ----------------
    g1 = jnp.dot(row_slices(xhpad_ref, 0), w1_ref[0],
                 preferred_element_type=jnp.float32)
    for ky in range(1, K):
        g1 = g1 + jnp.dot(row_slices(xhpad_ref, ky), w1_ref[ky],
                          preferred_element_type=jnp.float32)
    g1 = g1 + b_ref[...]                               # [bz | br | bq] row

    h = h_ref[...].reshape(M, WCh)                     # lane-dense, f32
    z = jax.nn.sigmoid(g1[:, 0:WCh])
    r = jax.nn.sigmoid(g1[:, WCh:2 * WCh])
    qx = g1[:, 2 * WCh:3 * WCh]

    # ---- pass 2: q's h-contribution from (r*h) ------------------------------
    rh = (r * h).astype(jnp.bfloat16)
    rhpad[...] = jnp.zeros(rhpad.shape, rhpad.dtype)   # keep zero halo
    for b in range(block_B):
        rhpad[b, p:p + H, p * Ch:p * Ch + WCh] = rh[b * H:(b + 1) * H, :]

    gq = jnp.dot(row_slices(rhpad, 0), w2_ref[0],
                 preferred_element_type=jnp.float32)
    for ky in range(1, K):
        gq = gq + jnp.dot(row_slices(rhpad, ky), w2_ref[ky],
                          preferred_element_type=jnp.float32)
    q = jnp.tanh(qx + gq)

    out = (1.0 - z) * h + z * q                        # (M, WCh) f32
    out_ref[...] = out.reshape(block_B, H, WCh)        # lane-dense store


def _banded_conv_weights(w_hwio, W_dim, p):
    """(K, K, Cpix, Cout) HWIO conv weight -> K banded matrices.

    Result shape (K, (W+2p)*Cpix, W_dim*Cout) with
      row index    jw * Cpix + c   (lane index of the zero-padded input row)
      column index j  * Cout + o   (output pixel, output channel)
      entry        w[ky, jw - j, c, o]   if 0 <= jw - j < K else 0.
    """
    K, _, Cpix, Cout = w_hwio.shape
    jw = jnp.arange(W_dim + 2 * p)[:, None]            # (W+2p, 1)
    j = jnp.arange(W_dim)[None, :]                      # (1, W)
    kx = jw - j                                         # (W+2p, W)
    mask = (kx >= 0) & (kx < K)
    g = w_hwio[:, jnp.clip(kx, 0, K - 1), :, :]         # (K, W+2p, W, Cpix, Cout)
    g = g * mask[None, :, :, None, None]
    g = jnp.transpose(g, (0, 1, 3, 2, 4))               # (K, W+2p, Cpix, W, Cout)
    return g.reshape(K, (W_dim + 2 * p) * Cpix, W_dim * Cout)


def conv_gru(x, h, wz, wr, wq, bz, br, bq, *, kernel_size):
    """x: (B, H, W, Cx), h: (B, H, W, Ch); conv weights HWIO (K, K, Cx+Ch, Ch);
    biases (Ch,).  Returns the new hidden state, (B, H, W, Ch) float32."""
    B, H, W, Cx = x.shape
    Ch = h.shape[-1]
    K = kernel_size
    p = K // 2
    Cin = Cx + Ch
    Wp = W + 2 * p
    WCh = W * Ch
    assert wz.shape == (K, K, Cin, Ch)

    # One-time weight/bias prep (hoist out of any scan over time steps).
    wq_x = wq.at[:, :, Cx:, :].set(0.0)          # pass-1 q uses only x channels
    w1 = jnp.concatenate(
        [_banded_conv_weights(wz, W, p),
         _banded_conv_weights(wr, W, p),
         _banded_conv_weights(wq_x, W, p)], axis=2).astype(jnp.bfloat16)
    w2 = _banded_conv_weights(wq[:, :, Cx:, :], W, p).astype(jnp.bfloat16)
    b_row = jnp.concatenate(
        [jnp.tile(bz, W), jnp.tile(br, W), jnp.tile(bq, W)]
    ).reshape(1, 3 * WCh).astype(jnp.float32)

    # Activation layout plumbing: pre-padded, lane-flattened bf16 x|h for the
    # MXU, plus an f32 (B, H, W*Ch) view of h for the blend / r*h.
    xh = jnp.concatenate([x, h], axis=-1)                        # (B,H,W,Cin)
    xhpad = jnp.pad(xh, ((0, 0), (p, p), (p, p), (0, 0)))
    xhpad = xhpad.reshape(B, H + 2 * p, Wp * Cin).astype(jnp.bfloat16)
    h2d = h.reshape(B, H, WCh)

    # 2 fat steps when B is even (both v7x TensorCores busy, minimal per-step
    # overhead on single-core v5e/v6e); block_B images stack along the M axis.
    block_B = B // 2 if (B >= 2 and B % 2 == 0) else 1
    nsteps = B // block_B

    kernel = functools.partial(_convgru_kernel, K=K, H=H, W=W, Cx=Cx, Ch=Ch,
                               block_B=block_B)

    out2d = pl.pallas_call(
        kernel,
        out_shape=jax.ShapeDtypeStruct((B, H, WCh), jnp.float32),
        grid_spec=pltpu.PrefetchScalarGridSpec(
            num_scalar_prefetch=0,
            grid=(nsteps,),
            in_specs=[
                pl.BlockSpec((block_B, H + 2 * p, Wp * Cin),
                             lambda b: (b, 0, 0)),                 # padded x|h
                pl.BlockSpec((block_B, H, WCh), lambda b: (b, 0, 0)),   # h
                pl.BlockSpec((K, Wp * Cin, 3 * WCh), lambda b: (0, 0, 0)),  # W1
                pl.BlockSpec((K, Wp * Ch, WCh), lambda b: (0, 0, 0)),       # W2
                pl.BlockSpec((1, 3 * WCh), lambda b: (0, 0)),               # bias
            ],
            out_specs=pl.BlockSpec((block_B, H, WCh), lambda b: (b, 0, 0)),
            scratch_shapes=[
                pltpu.VMEM((block_B, H + 2 * p, Wp * Ch), jnp.bfloat16),  # r*h pad
            ],
        ),
        compiler_params=pltpu.CompilerParams(
            dimension_semantics=("parallel",),
            vmem_limit_bytes=32 * 1024 * 1024,
        ),
    )(xhpad, h2d, w1, w2, b_row)

    return out2d.reshape(B, H, W, Ch)


def conv_gru_reference(x, h, wz, wr, wq, bz, br, bq, *, kernel_size):
    p = kernel_size // 2

    def conv(inp, w, b):
        out = jax.lax.conv_general_dilated(
            inp, w, window_strides=(1, 1), padding=[(p, p), (p, p)],
            dimension_numbers=("NHWC", "HWIO", "NHWC"),
            precision=jax.lax.Precision.HIGHEST)
        return out + b

    xh = jnp.concatenate([x, h], axis=-1)
    z = jax.nn.sigmoid(conv(xh, wz, bz))
    r = jax.nn.sigmoid(conv(xh, wr, br))
    xh2 = jnp.concatenate([x, r * h], axis=-1)
    q = jnp.tanh(conv(xh2, wq, bq))
    return (1.0 - z) * h + z * q


if __name__ == "__main__":
    # Small, deterministic problem: batch=2, x_channels=4, h_channels=8,
    # spatial 16x16, kernel_size=3 (matches ConvGru(4, 8, 3)).
    B, H, W = 2, 16, 16
    Cx, Ch, K = 4, 8, 3
    Cin = Cx + Ch

    key = jax.random.PRNGKey(0)
    keys = jax.random.split(key, 8)

    x = jax.random.normal(keys[0], (B, H, W, Cx), jnp.float32)
    h = jax.random.normal(keys[1], (B, H, W, Ch), jnp.float32)

    # PyTorch Conv2d default init: U(-bound, bound), bound = 1/sqrt(Cin*K*K),
    # weights in OIHW -> transpose to HWIO for our kernel layout.
    bound = 1.0 / jnp.sqrt(float(Cin * K * K))

    def make_w(k):
        w_oihw = jax.random.uniform(k, (Ch, Cin, K, K), jnp.float32, -bound, bound)
        return jnp.transpose(w_oihw, (2, 3, 1, 0))  # -> (K, K, Cin, Ch)

    wz, wr, wq = make_w(keys[2]), make_w(keys[3]), make_w(keys[4])
    bz = jax.random.uniform(keys[5], (Ch,), jnp.float32, -bound, bound)
    br = jax.random.uniform(keys[6], (Ch,), jnp.float32, -bound, bound)
    bq = jax.random.uniform(keys[7], (Ch,), jnp.float32, -bound, bound)

    out = conv_gru(x, h, wz, wr, wq, bz, br, bq, kernel_size=K)
    out = jax.block_until_ready(out)

    ref = conv_gru_reference(x, h, wz, wr, wq, bz, br, bq, kernel_size=K)
    ref = jax.block_until_ready(ref)

    assert out.shape == (B, H, W, Ch)
    # The MXU consumes bf16 operands (f32 accumulation), so expect ~1e-3-level
    # deviation from the f32 HIGHEST reference; indexing/layout bugs would show
    # up as O(0.1..1) errors, far outside this tolerance.
    err = float(jnp.max(jnp.abs(out - ref)))
    assert jnp.allclose(out, ref, atol=2e-2, rtol=2e-2), err

    print("KERNEL_OK")
</pallas_src>

<mosaic_0001>
module attributes {stable_mosaic.version = 11 : i64} {
  func.func @_convgru_kernel(%arg0: i32, %arg1: memref<1x18x216xbf16, #tpu.memory_space<vmem>>, %arg2: memref<1x16x128xf32, #tpu.memory_space<vmem>>, %arg3: memref<3x216x384xbf16, #tpu.memory_space<vmem>>, %arg4: memref<3x144x128xbf16, #tpu.memory_space<vmem>>, %arg5: memref<1x384xf32, #tpu.memory_space<vmem>>, %arg6: memref<1x16x128xf32, #tpu.memory_space<vmem>>, %arg7: memref<1x18x144xbf16, #tpu.memory_space<vmem>>) attributes {dimension_semantics = [#tpu.dimension_semantics<parallel>], iteration_bounds = array<i64: 2>, scalar_prefetch = 0 : i64, scratch_operands = 1 : i64, tpu.core_type = #tpu.core_type<tc>, window_params = [{transform_indices = @transform_0, window_bounds = array<i64: 1, 18, 216>}, {transform_indices = @transform_1, window_bounds = array<i64: 1, 16, 128>}, {pipeline_mode = #tpu.pipeline_mode<synchronous>, transform_indices = @transform_2, window_bounds = array<i64: 3, 216, 384>}, {pipeline_mode = #tpu.pipeline_mode<synchronous>, transform_indices = @transform_3, window_bounds = array<i64: 3, 144, 128>}, {pipeline_mode = #tpu.pipeline_mode<synchronous>, transform_indices = @transform_4, window_bounds = array<i64: 1, 384>}, {transform_indices = @transform_5, window_bounds = array<i64: 1, 16, 128>}]} {
    %c0 = arith.constant 0 : index
    %c0_0 = arith.constant 0 : index
    %c0_1 = arith.constant 0 : index
    %0 = vector.load %arg1[%c0, %c0_0, %c0_1] : memref<1x18x216xbf16, #tpu.memory_space<vmem>>, vector<1x16x216xbf16>
    %1 = vector.shape_cast %0 : vector<1x16x216xbf16> to vector<16x216xbf16>
    %c0_2 = arith.constant 0 : index
    %c0_3 = arith.constant 0 : index
    %c0_4 = arith.constant 0 : index
    %2 = vector.load %arg3[%c0_2, %c0_3, %c0_4] : memref<3x216x384xbf16, #tpu.memory_space<vmem>>, vector<1x216x384xbf16>
    %3 = vector.shape_cast %2 : vector<1x216x384xbf16> to vector<216x384xbf16>
    %cst = arith.constant dense<0.000000e+00> : vector<16x384xf32>
    %4 = tpu.matmul %1, %3, %cst {dimension_numbers = #tpu.dot_dimension_numbers<[1], [0], [0], [1], [0, 0, 1, 1], [], []>} : vector<16x216xbf16>, vector<216x384xbf16>, vector<16x384xf32> -> vector<16x384xf32>
    %c0_5 = arith.constant 0 : index
    %c1 = arith.constant 1 : index
    %c0_6 = arith.constant 0 : index
    %5 = vector.load %arg1[%c0_5, %c1, %c0_6] : memref<1x18x216xbf16, #tpu.memory_space<vmem>>, vector<1x16x216xbf16>
    %6 = vector.shape_cast %5 : vector<1x16x216xbf16> to vector<16x216xbf16>
    %c1_7 = arith.constant 1 : index
    %c0_8 = arith.constant 0 : index
    %c0_9 = arith.constant 0 : index
    %7 = vector.load %arg3[%c1_7, %c0_8, %c0_9] : memref<3x216x384xbf16, #tpu.memory_space<vmem>>, vector<1x216x384xbf16>
    %8 = vector.shape_cast %7 : vector<1x216x384xbf16> to vector<216x384xbf16>
    %cst_10 = arith.constant dense<0.000000e+00> : vector<16x384xf32>
    %9 = tpu.matmul %6, %8, %cst_10 {dimension_numbers = #tpu.dot_dimension_numbers<[1], [0], [0], [1], [0, 0, 1, 1], [], []>} : vector<16x216xbf16>, vector<216x384xbf16>, vector<16x384xf32> -> vector<16x384xf32>
    %10 = arith.addf %4, %9 : vector<16x384xf32>
    %c0_11 = arith.constant 0 : index
    %c2 = arith.constant 2 : index
    %c0_12 = arith.constant 0 : index
    %11 = vector.load %arg1[%c0_11, %c2, %c0_12] : memref<1x18x216xbf16, #tpu.memory_space<vmem>>, vector<1x16x216xbf16>
    %12 = vector.shape_cast %11 : vector<1x16x216xbf16> to vector<16x216xbf16>
    %c2_13 = arith.constant 2 : index
    %c0_14 = arith.constant 0 : index
    %c0_15 = arith.constant 0 : index
    %13 = vector.load %arg3[%c2_13, %c0_14, %c0_15] : memref<3x216x384xbf16, #tpu.memory_space<vmem>>, vector<1x216x384xbf16>
    %14 = vector.shape_cast %13 : vector<1x216x384xbf16> to vector<216x384xbf16>
    %cst_16 = arith.constant dense<0.000000e+00> : vector<16x384xf32>
    %15 = tpu.matmul %12, %14, %cst_16 {dimension_numbers = #tpu.dot_dimension_numbers<[1], [0], [0], [1], [0, 0, 1, 1], [], []>} : vector<16x216xbf16>, vector<216x384xbf16>, vector<16x384xf32> -> vector<16x384xf32>
    %16 = arith.addf %10, %15 : vector<16x384xf32>
    %c0_17 = arith.constant 0 : index
    %c0_18 = arith.constant 0 : index
    %17 = vector.load %arg5[%c0_17, %c0_18] : memref<1x384xf32, #tpu.memory_space<vmem>>, vector<1x384xf32>
    %18 = vector.broadcast %17 : vector<1x384xf32> to vector<16x384xf32>
    %19 = arith.addf %16, %18 : vector<16x384xf32>
    %c0_19 = arith.constant 0 : index
    %c0_20 = arith.constant 0 : index
    %c0_21 = arith.constant 0 : index
    %20 = vector.load %arg2[%c0_19, %c0_20, %c0_21] : memref<1x16x128xf32, #tpu.memory_space<vmem>>, vector<1x16x128xf32>
    %21 = vector.shape_cast %20 : vector<1x16x128xf32> to vector<16x128xf32>
    %22 = vector.extract_strided_slice %19 {offsets = [0, 0], sizes = [16, 128], strides = [1, 1]} : vector<16x384xf32> to vector<16x128xf32>
    %23 = arith.negf %22 : vector<16x128xf32>
    %24 = math.exp %23 : vector<16x128xf32>
    %cst_22 = arith.constant 1.000000e+00 : f32
    %25 = vector.broadcast %cst_22 : f32 to vector<16x128xf32>
    %26 = arith.addf %25, %24 : vector<16x128xf32>
    %27 = arith.divf %25, %26 : vector<16x128xf32>
    %28 = vector.extract_strided_slice %19 {offsets = [0, 128], sizes = [16, 128], strides = [1, 1]} : vector<16x384xf32> to vector<16x128xf32>
    %29 = arith.negf %28 : vector<16x128xf32>
    %30 = math.exp %29 : vector<16x128xf32>
    %cst_23 = arith.constant 1.000000e+00 : f32
    %31 = vector.broadcast %cst_23 : f32 to vector<16x128xf32>
    %32 = arith.addf %31, %30 : vector<16x128xf32>
    %33 = arith.divf %31, %32 : vector<16x128xf32>
    %34 = vector.extract_strided_slice %19 {offsets = [0, 256], sizes = [16, 128], strides = [1, 1]} : vector<16x384xf32> to vector<16x128xf32>
    %35 = arith.mulf %33, %21 : vector<16x128xf32>
    %36 = arith.truncf %35 : vector<16x128xf32> to vector<16x128xbf16>
    %cst_24 = arith.constant 0.000000e+00 : bf16
    %37 = vector.broadcast %cst_24 : bf16 to vector<1x18x144xbf16>
    %c0_25 = arith.constant 0 : index
    %c0_26 = arith.constant 0 : index
    %c0_27 = arith.constant 0 : index
    %38 = vector.load %arg7[%c0_25, %c0_26, %c0_27] : memref<1x18x144xbf16, #tpu.memory_space<vmem>>, vector<1x18x144xbf16>
    tpu.vector_store %arg7[%c0_25, %c0_26, %c0_27], %37 {strides = array<i32>} : memref<1x18x144xbf16, #tpu.memory_space<vmem>>, vector<1x18x144xbf16>,
    %c0_28 = arith.constant 0 : index
    %c1_29 = arith.constant 1 : index
    %c8 = arith.constant 8 : index
    %39 = vector.load %arg7[%c0_28, %c1_29, %c8] : memref<1x18x144xbf16, #tpu.memory_space<vmem>>, vector<1x16x128xbf16>
    %40 = vector.shape_cast %39 : vector<1x16x128xbf16> to vector<16x128xbf16>
    %41 = vector.shape_cast %36 : vector<16x128xbf16> to vector<1x16x128xbf16>
    tpu.vector_store %arg7[%c0_28, %c1_29, %c8], %41 {strides = array<i32>} : memref<1x18x144xbf16, #tpu.memory_space<vmem>>, vector<1x16x128xbf16>,
    %c0_30 = arith.constant 0 : index
    %c0_31 = arith.constant 0 : index
    %c0_32 = arith.constant 0 : index
    %42 = vector.load %arg7[%c0_30, %c0_31, %c0_32] : memref<1x18x144xbf16, #tpu.memory_space<vmem>>, vector<1x16x144xbf16>
    %43 = vector.shape_cast %42 : vector<1x16x144xbf16> to vector<16x144xbf16>
    %c0_33 = arith.constant 0 : index
    %c0_34 = arith.constant 0 : index
    %c0_35 = arith.constant 0 : index
    %44 = vector.load %arg4[%c0_33, %c0_34, %c0_35] : memref<3x144x128xbf16, #tpu.memory_space<vmem>>, vector<1x144x128xbf16>
    %45 = vector.shape_cast %44 : vector<1x144x128xbf16> to vector<144x128xbf16>
    %cst_36 = arith.constant dense<0.000000e+00> : vector<16x128xf32>
    %46 = tpu.matmul %43, %45, %cst_36 {dimension_numbers = #tpu.dot_dimension_numbers<[1], [0], [0], [1], [0, 0, 1, 1], [], []>} : vector<16x144xbf16>, vector<144x128xbf16>, vector<16x128xf32> -> vector<16x128xf32>
    %c0_37 = arith.constant 0 : index
    %c1_38 = arith.constant 1 : index
    %c0_39 = arith.constant 0 : index
    %47 = vector.load %arg7[%c0_37, %c1_38, %c0_39] : memref<1x18x144xbf16, #tpu.memory_space<vmem>>, vector<1x16x144xbf16>
    %48 = vector.shape_cast %47 : vector<1x16x144xbf16> to vector<16x144xbf16>
    %c1_40 = arith.constant 1 : index
    %c0_41 = arith.constant 0 : index
    %c0_42 = arith.constant 0 : index
    %49 = vector.load %arg4[%c1_40, %c0_41, %c0_42] : memref<3x144x128xbf16, #tpu.memory_space<vmem>>, vector<1x144x128xbf16>
    %50 = vector.shape_cast %49 : vector<1x144x128xbf16> to vector<144x128xbf16>
    %cst_43 = arith.constant dense<0.000000e+00> : vector<16x128xf32>
    %51 = tpu.matmul %48, %50, %cst_43 {dimension_numbers = #tpu.dot_dimension_numbers<[1], [0], [0], [1], [0, 0, 1, 1], [], []>} : vector<16x144xbf16>, vector<144x128xbf16>, vector<16x128xf32> -> vector<16x128xf32>
    %52 = arith.addf %46, %51 : vector<16x128xf32>
    %c0_44 = arith.constant 0 : index
    %c2_45 = arith.constant 2 : index
    %c0_46 = arith.constant 0 : index
    %53 = vector.load %arg7[%c0_44, %c2_45, %c0_46] : memref<1x18x144xbf16, #tpu.memory_space<vmem>>, vector<1x16x144xbf16>
    %54 = vector.shape_cast %53 : vector<1x16x144xbf16> to vector<16x144xbf16>
    %c2_47 = arith.constant 2 : index
    %c0_48 = arith.constant 0 : index
    %c0_49 = arith.constant 0 : index
    %55 = vector.load %arg4[%c2_47, %c0_48, %c0_49] : memref<3x144x128xbf16, #tpu.memory_space<vmem>>, vector<1x144x128xbf16>
    %56 = vector.shape_cast %55 : vector<1x144x128xbf16> to vector<144x128xbf16>
    %cst_50 = arith.constant dense<0.000000e+00> : vector<16x128xf32>
    %57 = tpu.matmul %54, %56, %cst_50 {dimension_numbers = #tpu.dot_dimension_numbers<[1], [0], [0], [1], [0, 0, 1, 1], [], []>} : vector<16x144xbf16>, vector<144x128xbf16>, vector<16x128xf32> -> vector<16x128xf32>
    %58 = arith.addf %52, %57 : vector<16x128xf32>
    %59 = arith.addf %34, %58 : vector<16x128xf32>
    %60 = math.tanh %59 : vector<16x128xf32>
    %cst_51 = arith.constant 1.000000e+00 : f32
    %61 = vector.broadcast %cst_51 : f32 to vector<16x128xf32>
    %62 = arith.subf %61, %27 : vector<16x128xf32>
    %63 = arith.mulf %62, %21 : vector<16x128xf32>
    %64 = arith.mulf %27, %60 : vector<16x128xf32>
    %65 = arith.addf %63, %64 : vector<16x128xf32>
    %66 = vector.shape_cast %65 : vector<16x128xf32> to vector<1x16x128xf32>
    %c0_52 = arith.constant 0 : index
    %c0_53 = arith.constant 0 : index
    %c0_54 = arith.constant 0 : index
    %67 = vector.load %arg6[%c0_52, %c0_53, %c0_54] : memref<1x16x128xf32, #tpu.memory_space<vmem>>, vector<1x16x128xf32>
    tpu.vector_store %arg6[%c0_52, %c0_53, %c0_54], %66 {strides = array<i32>} : memref<1x16x128xf32, #tpu.memory_space<vmem>>, vector<1x16x128xf32>,
    return
  }
  func.func @transform_0(%arg0: i32) -> (i32, i32, i32) {
    %c0_i32 = arith.constant 0 : i32
    %c0_i32_0 = arith.constant 0 : i32
    %c0_i32_1 = arith.constant 0 : i32
    return %arg0, %c0_i32, %c0_i32_0 : i32, i32, i32
  }
  func.func @transform_1(%arg0: i32) -> (i32, i32, i32) {
    %c0_i32 = arith.constant 0 : i32
    %c0_i32_0 = arith.constant 0 : i32
    %c0_i32_1 = arith.constant 0 : i32
    return %arg0, %c0_i32, %c0_i32_0 : i32, i32, i32
  }
  func.func @transform_2(%arg0: i32) -> (i32, i32, i32) {
    %c0_i32 = arith.constant 0 : i32
    %c0_i32_0 = arith.constant 0 : i32
    %c0_i32_1 = arith.constant 0 : i32
    %c0_i32_2 = arith.constant 0 : i32
    return %c0_i32, %c0_i32_0, %c0_i32_1 : i32, i32, i32
  }
  func.func @transform_3(%arg0: i32) -> (i32, i32, i32) {
    %c0_i32 = arith.constant 0 : i32
    %c0_i32_0 = arith.constant 0 : i32
    %c0_i32_1 = arith.constant 0 : i32
    %c0_i32_2 = arith.constant 0 : i32
    return %c0_i32, %c0_i32_0, %c0_i32_1 : i32, i32, i32
  }
  func.func @transform_4(%arg0: i32) -> (i32, i32) {
    %c0_i32 = arith.constant 0 : i32
    %c0_i32_0 = arith.constant 0 : i32
    %c0_i32_1 = arith.constant 0 : i32
    return %c0_i32, %c0_i32_0 : i32, i32
  }
  func.func @transform_5(%arg0: i32) -> (i32, i32, i32) {
    %c0_i32 = arith.constant 0 : i32
    %c0_i32_0 = arith.constant 0 : i32
    %c0_i32_1 = arith.constant 0 : i32
    return %arg0, %c0_i32, %c0_i32_0 : i32, i32, i32
  }
}

</mosaic_0001>

<bundles_post_ra>
// kernel: tpu_custom_call.1
= control target key start
LH: loop header
LB: loop body
LE: loop exit
PB: predicated region body
PF: predicated region fallthrough
CT: control target
= control target key end

     0   :  { %10 = vsyncpa [#allocation4], 0  ;;  %s3427_s0 = inlined_call_operand.vmem [shape: bf16[2,18,216], index: 0, kind: input, shape index: {}]   ;;  %s3428_s1 = inlined_call_operand.vmem [shape: f32[2,16,128], index: 1, kind: input, shape index: {}]   ;;  %s3429_s2 = inlined_call_operand.hbm [shape: bf16[3,216,384], index: 2, kind: input, shape index: {}]   ;;  %s3430_s3 = inlined_call_operand.hbm [shape: bf16[3,144,128], index: 3, kind: input, shape index: {}]   ;;  %s3431_s4 = inlined_call_operand.vmem [shape: f32[1,384], index: 4, kind: input, shape index: {}]   ;;  %s3432_s5 = inlined_call_operand.hbm [shape: f32[2,16,128], index: 5, kind: output, shape index: {}]  }
   0x1   :  { %11 = vsyncpa [#allocation7], 0 }
   0x2   :  { %12 = vsyncpa [#allocation5], 0 }
   0x3   :  { %14 = vsyncpa [#allocation5 + $0x1], 0  ;;  %s3113_s18 = smov 0   ;;  %s3115_s19 = smov 0  }
   0x4   :  { %s3117_s20 = smov 0   ;;  %s3119_s21 = smov 0  }
   0x5 LB: > { %s3134_s22 = sadd.s32 4294967295, %s3072_s21   ;;  %s2099_s23 = sadd.s32 4294967294, %s3072_s21   ;;  %s3072_s21 = sphi %s3119_s21, %s3445_s21   ;;  %s3068_s20 = sphi %s3117_s20, %s3444_s20   ;;  %s3064_s19 = sphi %s3115_s19, %s3443_s19   ;;  %s3060_s18 = sphi %s3113_s18, %s3442_s18  }
   0x6   : > { %s3138_s24 = sadd.s32 1, %s3072_s21   ;;  %s142_s25 = sadd.s32 1, %s3068_s20 }
   0x7   : > { %s139_s26 = ssub.s32 %s3072_s21, %s3138_s24  ;;  %p152_p0 = scmp.ne.s32.totalorder %s3068_s20, %s3064_s19 }
   0x8   : > { %p140_p1 = scmp.eq.s32.totalorder %s139_s26, 0  ;;  %p153_p2 = scmp.eq.s32.totalorder %s3134_s22, 1 }
   0x9   : > { %p158_p3 = scmp.ne.s32.totalorder %s3064_s19, %s3060_s18  ;;  %p159_p4 = scmp.eq.s32.totalorder %s2099_s23, 1 }
   0xa   : > { %s3149_s27 = scalar_select %p140_p1, %s3068_s20, %s142_s25  }
   0xb   : > { %p3151_p5 = por %p153_p2, %p152_p0  ;;  %p3155_p6 = por %p159_p4, %p158_p3 }
   0xc   : > { %p2100_p7 = scmp.ge.s32.totalorder %s3072_s21, 1  ;;  %p166_p8 = scmp.lt.s32.totalorder %s3072_s21, 3 }
   0xd   : > { %p2876_p9 = scmp.eq.s32.totalorder %s3134_s22, 0  ;;  %s177_s8 = sshll.u32 %s3429_s2, 4  ;;  %s178_s8 = int_to_ptr.hbm [resolvable:$true] %s177_s8 }
   0xe   : > { %p3162_p10 = pnand %p2100_p7, %p166_p8  ;;  %s3074_s9 = smov [#allocation3]  }
   0xf   : > { %s179_s10 = sshll.u32 %s3074_s9, 4  ;;  %s191_s13 = sshll.u32 %s3430_s3, 4  ;;  %s180_s10 = int_to_ptr.vmem [resolvable:$true] %s179_s10  ;;  %s192_s13 = int_to_ptr.hbm [resolvable:$true] %s191_s13 }
  0x10   : > { %p2865_p11 = pneg %p3162_p10  ;;  %s3075_s14 = smov 192  }
  0x11   : > { %s3076_s15 = smov 12   ;;  %s3077_s16 = smov [#allocation6]  }
  0x12   : > { %p2866_p12 = pnand %p2876_p9, %p2865_p11  ;;  %s193_s17 = sshll.u32 %s3077_s16, 4  ;;  %s194_s17 = int_to_ptr.vmem [resolvable:$true] %s193_s17 }
  0x13   : > { %s3078_s23 = smov 64   ;;  %s3079_s25 = smov 4  }
  0x14   : > { %2868 = dma.hbm_to_vmem [thread:$0]  (!%p2866_p12), %s178_s8, 15552, %s180_s10, [#allocation4], %s3075_s14, %s3075_s14, %s3076_s15  }
  0x15   : > { %2871 = dma.hbm_to_vmem [thread:$0]  (!%p2866_p12), %s192_s13, 3456, %s194_s17, [#allocation7], %s3078_s23, %s3078_s23, %s3079_s25  }
  0x16   : > { %228 = sbr.rel (%p3162_p10) target bundleno = 649 (0x289), region = 40 }
  0x1b   : > { %3047 = dma.done.wait (%p2876_p9), [#allocation4], 15552  }
  0x1c   : > { %3049 = vsyncadd (%p2876_p9), [#allocation4], 4294951744 }
  0x1d   : > { %3051 = dma.done.wait (%p2876_p9), [#allocation7], 3456  }
  0x1e   : > { %3053 = vsyncadd (%p2876_p9), [#allocation7], 4294963840  ;;  %v2197_v0 = vld [vmem:[#allocation3 + $0x1ec] sm:$0xf]  ;;  %v2770_v1 = vld [vmem:[#allocation3 + $0x1f4] sm:$0xf0] }
  0x1f   : > { %v2769_v2 = vld [vmem:[#allocation3 + $0x1f0] sm:$0xf]  ;;  %v2198_v3 = vor.u32 %v2770_v1, %v2197_v0  ;;  %v2199_v4 = vld [vmem:[#allocation3 + $0x1f8] sm:$0xf0]  ;;  %v2185_v6 = vld [vmem:[#allocation3 + $0x1d4] sm:$0xf] }
  0x20   : > { %v388_v5 = vld [vmem:[#allocation3 + $0x27c] sm:$0xff]  ;;  %v2202_v7 = vor.u32 %v2769_v2, %v2199_v4  ;;  %v2766_v11 = vld [vmem:[#allocation3 + $0x1d8] sm:$0xf]  ;;  %v2187_v12 = vld [vmem:[#allocation3 + $0x1e0] sm:$0xf0]  ;;  %vm649_vm0 = vcmask 1043456  }
  0x21   : > { %v561_v8 = vunpack.c.l.b16 %v388_v5  ;;  %v562_v9 = vunpack.c.h.b16 %v388_v5  ;;  %v2767_v10 = vld [vmem:[#allocation3 + $0x1dc] sm:$0xf0]  ;;  %659 = vmatpush.bf16.msra.mxu0 %v2198_v3  ;;  %v2257_v13 = vld [vmem:[#allocation3 + $0x264] sm:$0xf]  ;;  %v2785_v14 = vld [vmem:[#allocation3 + $0x26c] sm:$0xf0]  ;;  %v2190_v18 = vor.u32 %v2766_v11, %v2187_v12 }
  0x22   : > { %687 = vmatpush.bf16.msra.mxu2 %v2202_v7  ;;  %v2186_v17 = vor.u32 %v2767_v10, %v2185_v6  ;;  %v2784_v19 = vld [vmem:[#allocation3 + $0x268] sm:$0xf]  ;;  %v2259_v20 = vld [vmem:[#allocation3 + $0x270] sm:$0xf0]  ;;  %v2173_v21 = vld [vmem:[#allocation3 + $0x1bc] sm:$0xf]  ;;  %v2258_v27 = vor.u32 %v2785_v14, %v2257_v13 }
  0x23   : > { %v603_v15 = vpack.c.b16 %v561_v8, %v561_v8  ;;  %v604_v16 = vpack.c.b16 %v562_v9, %v562_v9  ;;  %v2764_v22 = vld [vmem:[#allocation3 + $0x1c4] sm:$0xf0]  ;;  %v2763_v23 = vld [vmem:[#allocation3 + $0x1c0] sm:$0xf]  ;;  %v2175_v24 = vld [vmem:[#allocation3 + $0x1c8] sm:$0xf0]  ;;  %v2262_v28 = vor.u32 %v2784_v19, %v2259_v20 }
  0x24   : > { %p267_p13 = scmp.lt.s32.totalorder %s3134_s22, 1  ;;  %v2245_v29 = vld [vmem:[#allocation3 + $0x24c] sm:$0xf]  ;;  %v2782_v30 = vld [vmem:[#allocation3 + $0x254] sm:$0xf0]  ;;  %v2174_v31 = vor.u32 %v2764_v22, %v2173_v21  ;;  %v2178_v32 = vor.u32 %v2763_v23, %v2175_v24  ;;  %vm645_vm2 = vcmask 719872  }
  0x25   : > { %v651_v25 = vsel %vm649_vm0, %v603_v15, 0  ;;  %v654_v26 = vsel %vm649_vm0, %v604_v16, 0  ;;  %660 = vmatpush.bf16.msra.mxu0 %v2186_v17  ;;  %v2781_v33 = vld [vmem:[#allocation3 + $0x250] sm:$0xf]  ;;  %v2247_v34 = vld [vmem:[#allocation3 + $0x258] sm:$0xf0]  ;;  %v2246_v39 = vor.u32 %v2782_v30, %v2245_v29 }
  0x26   : > { %675 = vmatpush.bf16.msra.mxu1 %v651_v25  ;;  %703 = vmatpush.bf16.msra.mxu3 %v654_v26  ;;  %v2161_v35 = vld [vmem:[#allocation3 + $0x1a4] sm:$0xf]  ;;  %v2761_v36 = vld [vmem:[#allocation3 + $0x1ac] sm:$0xf0]  ;;  %v2760_v37 = vld [vmem:[#allocation3 + $0x1a8] sm:$0xf]  ;;  %v2250_v40 = vor.u32 %v2781_v33, %v2247_v34 }
  0x27   : > { %688 = vmatpush.bf16.msra.mxu2 %v2190_v18  ;;  %v2163_v38 = vld [vmem:[#allocation3 + $0x1b0] sm:$0xf0]  ;;  %s3192_s26 = scalar_select %p267_p13, %s3134_s22, 1  ;;  %v2779_v42 = vld [vmem:[#allocation3 + $0x23c] sm:$0xf0]  ;;  %v2162_v43 = vor.u32 %v2761_v36, %v2161_v35  ;;  %v3200_v13 = vld [vmem:[#allocation3 + $0x138] sm:$0xff] }
  0x28   : > { %v2233_v41 = vld [vmem:[#allocation3 + $0x234] sm:$0xf]  ;;  %v2166_v44 = vor.u32 %v2760_v37, %v2163_v38  ;;  %v2778_v45 = vld [vmem:[#allocation3 + $0x238] sm:$0xf]  ;;  %v2235_v46 = vld [vmem:[#allocation3 + $0x240] sm:$0xf0]  ;;  %v876_v20 = vunpack.c.l.b16 %v3200_v13 }
  0x29   : > { %661 = vmatpush.bf16.msra.mxu0 %v2174_v31  ;;  %v2149_v47 = vld [vmem:[#allocation3 + $0x18c] sm:$0xf]  ;;  %v2758_v48 = vld [vmem:[#allocation3 + $0x194] sm:$0xf0]  ;;  %v2757_v49 = vld [vmem:[#allocation3 + $0x190] sm:$0xf]  ;;  %v2234_v51 = vor.u32 %v2779_v42, %v2233_v41  ;;  %v2238_v52 = vor.u32 %v2778_v45, %v2235_v46 }
  0x2a   : > { %676 = vmatpush.bf16.msra.mxu1 %v2258_v27  ;;  %704 = vmatpush.bf16.msra.mxu3 %v2262_v28  ;;  %v2151_v50 = vld [vmem:[#allocation3 + $0x198] sm:$0xf0]  ;;  %s2854_s30 = smul.u32 24, %s3192_s26  ;;  %v2776_v54 = vld [vmem:[#allocation3 + $0x224] sm:$0xf0]  ;;  %v2150_v56 = vor.u32 %v2758_v48, %v2149_v47  ;;  %vm1116_vm3 = vcmask 1046528  }
  0x2b   : > { %689 = vmatpush.bf16.msra.mxu2 %v2178_v32  ;;  %v2221_v53 = vld [vmem:[#allocation3 + $0x21c] sm:$0xf]  ;;  %v2775_v55 = vld [vmem:[#allocation3 + $0x220] sm:$0xf]  ;;  %v2154_v57 = vor.u32 %v2757_v49, %v2151_v50  ;;  %v2223_v58 = vld [vmem:[#allocation3 + $0x228] sm:$0xf0] }
  0x2c   : > { %v2137_v59 = vld [vmem:[#allocation3 + $0x174] sm:$0xf]  ;;  %v2755_v60 = vld [vmem:[#allocation3 + $0x17c] sm:$0xf0]  ;;  %v2754_v61 = vld [vmem:[#allocation3 + $0x178] sm:$0xf]  ;;  %v2222_v1 = vor.u32 %v2776_v54, %v2221_v53  ;;  %v2226_v2 = vor.u32 %v2775_v55, %v2223_v58  ;;  %s3198_s8 = scalar_lea.vmem %s3427_s0, %s2854_s30 }
  0x2d   : > { %662 = vmatpush.bf16.msra.mxu0 %v2162_v43  ;;  %v2139_v62 = vld [vmem:[#allocation3 + $0x180] sm:$0xf0]  ;;  %v2773_v4 = vld [vmem:[#allocation3 + $0x20c] sm:$0xf0]  ;;  %v2772_v5 = vld [vmem:[#allocation3 + $0x208] sm:$0xf]  ;;  %v2138_v6 = vor.u32 %v2755_v60, %v2137_v59 }
  0x2e   : > { %677 = vmatpush.bf16.msra.mxu1 %v2246_v39  ;;  %705 = vmatpush.bf16.msra.mxu3 %v2250_v40  ;;  %v389_v63 = vld [vmem:[#allocation3 + $0x284] sm:$0xf]  ;;  %v2142_v7 = vor.u32 %v2754_v61, %v2139_v62  ;;  %v2211_v8 = vld [vmem:[#allocation3 + $0x210] sm:$0xf0]  ;;  %v2125_v9 = vld [vmem:[#allocation3 + $0x15c] sm:$0xf]  ;;  %v918_v39 = vpack.c.b16 %v876_v20, %v876_v20 }
  0x2f   : > { %690 = vmatpush.bf16.msra.mxu2 %v2166_v44  ;;  %v563_v0 = vunpack.c.l.b16 %v389_v63  ;;  %v2209_v3 = vld [vmem:[#allocation3 + $0x204] sm:$0xf]  ;;  %v2752_v10 = vld [vmem:[#allocation3 + $0x164] sm:$0xf0]  ;;  %v2751_v11 = vld [vmem:[#allocation3 + $0x160] sm:$0xf]  ;;  %v2214_v19 = vor.u32 %v2772_v5, %v2211_v8 }
  0x30   : > { %v2127_v12 = vld [vmem:[#allocation3 + $0x168] sm:$0xf0]  ;;  %v2205_v14 = vld [vmem:[#allocation3 + $0x1f4] sm:$0xf]  ;;  %v2771_v15 = vld [vmem:[#allocation3 + $0x1fc] sm:$0xf0]  ;;  %v2210_v18 = vor.u32 %v2773_v4, %v2209_v3  ;;  %v2126_v21 = vor.u32 %v2752_v10, %v2125_v9 }
  0x31   : > { %663 = vmatpush.bf16.msra.mxu0 %v2150_v56  ;;  %v605_v16 = vpack.c.b16 %v563_v0, %v563_v0  ;;  %v278_v17 = vld [vmem:[%s3198_s8] sm:$0xff]  ;;  %v2130_v22 = vor.u32 %v2751_v11, %v2127_v12  ;;  %v2113_v23 = vld [vmem:[#allocation3 + $0x144] sm:$0xf]  ;;  %v2749_v24 = vld [vmem:[#allocation3 + $0x14c] sm:$0xf0]  ;;  %v2206_v26 = vor.u32 %v2771_v15, %v2205_v14  ;;  %v963_v61 = vsel %vm649_vm0, %v918_v39, 0 }
  0x32   : > { %678 = vmatpush.bf16.msra.mxu1 %v2234_v51  ;;  %706 = vmatpush.bf16.msra.mxu3 %v2238_v52  ;;  %v2748_v25 = vld [vmem:[#allocation3 + $0x148] sm:$0xf]  ;;  %v2115_v27 = vld [vmem:[#allocation3 + $0x150] sm:$0xf0]  ;;  %v2193_v28 = vld [vmem:[#allocation3 + $0x1dc] sm:$0xf]  ;;  %v393_v30 = vunpack.c.l.b16 %v278_v17  ;;  %v394_v31 = vunpack.c.h.b16 %v278_v17  ;;  %v2114_v36 = vor.u32 %v2749_v24, %v2113_v23 }
  0x33   : > { %691 = vmatpush.bf16.msra.mxu2 %v2154_v57  ;;  %v2768_v29 = vld [vmem:[#allocation3 + $0x1e4] sm:$0xf0]  ;;  %v657_v32 = vsel %vm649_vm0, %v605_v16, 0  ;;  %v2265_v33 = vld [vmem:[#allocation3 + $0x26c] sm:$0xf]  ;;  %v3206_v35 = vld [vmem:[%s3198_s8 + $0x8] sm:$0xff]  ;;  %v2118_v43 = vor.u32 %v2748_v25, %v2115_v27 }
  0x34   : > { %v2786_v34 = vld [vmem:[#allocation3 + $0x274] sm:$0xf0]  ;;  %v2356_v37 = vld [vmem:[#allocation3 + $0xa8] sm:$0xf]  ;;  %v2731_v38 = vld [vmem:[#allocation3 + $0xb0] sm:$0xf0]  ;;  %v395_v41 = vunpack.c.l.b16 %v3206_v35  ;;  %v396_v42 = vunpack.c.h.b16 %v3206_v35  ;;  %v2194_v44 = vor.u32 %v2768_v29, %v2193_v28 }
  0x35   : > { %664 = vmatpush.bf16.msra.mxu0 %v2138_v6  ;;  %v334_v40 = vld [vmem:[%s3198_s8 + $0x10] sm:$0x11]  ;;  %v2181_v45 = vld [vmem:[#allocation3 + $0x1c4] sm:$0xf]  ;;  %v2765_v46 = vld [vmem:[#allocation3 + $0x1cc] sm:$0xf0]  ;;  %v2266_v49 = vor.u32 %v2786_v34, %v2265_v33  ;;  %v2357_v55 = vor.u32 %v2731_v38, %v2356_v37 }
  0x36   : > { %679 = vmatpush.bf16.msra.mxu1 %v2222_v1  ;;  %707 = vmatpush.bf16.msra.mxu3 %v2226_v2  ;;  %v397_v47 = vunpack.c.l.b16 %v334_v40  ;;  %v398_v48 = vunpack.c.h.b16 %v334_v40  ;;  %v2253_v50 = vld [vmem:[#allocation3 + $0x254] sm:$0xf]  ;;  %v2783_v51 = vld [vmem:[#allocation3 + $0x25c] sm:$0xf0]  ;;  %v2344_v52 = vld [vmem:[#allocation3 + $0x90] sm:$0xf]  ;;  %v3213_v53 = vpack.c.b16 %v395_v41, %v393_v30  ;;  %v3217_v54 = vpack.c.b16 %v396_v42, %v394_v31 }
  0x37   : > { %692 = vmatpush.bf16.msra.mxu2 %v2142_v7  ;;  %v2728_v56 = vld [vmem:[#allocation3 + $0x98] sm:$0xf0]  ;;  %v2416_v57 = vld [vmem:[#allocation3 + $0x120] sm:$0xf]  ;;  %v2746_v58 = vld [vmem:[#allocation3 + $0x128] sm:$0xf0]  ;;  %v2182_v62 = vor.u32 %v2765_v46, %v2181_v45  ;;  %v2254_v8 = vor.u32 %v2783_v51, %v2253_v50 }
  0x38   : > { %v3219_v59 = vpack.c.b16 %v397_v47, %v397_v47  ;;  %v3221_v60 = vpack.c.b16 %v398_v48, %v398_v48  ;;  %v405_v63 = vshrl.u32 %v3213_v53, 16  ;;  %v407_v0 = vshll.u32 %v3213_v53, 16  ;;  %v2169_v1 = vld [vmem:[#allocation3 + $0x1ac] sm:$0xf]  ;;  %v2762_v2 = vld [vmem:[#allocation3 + $0x1b4] sm:$0xf0] }
  0x39   : > { %665 = vmatpush.bf16.msra.mxu0 %v2126_v21  ;;  %v2241_v3 = vld [vmem:[#allocation3 + $0x23c] sm:$0xf]  ;;  %v417_v5 = vshrl.u32 %v3217_v54, 16  ;;  %v419_v6 = vshll.u32 %v3217_v54, 16  ;;  %v2345_v9 = vor.u32 %v2728_v56, %v2344_v52  ;;  %v2417_v10 = vor.u32 %v2746_v58, %v2416_v57  ;;  %v2780_v11 = vld [vmem:[#allocation3 + $0x244] sm:$0xf0] }
  0x3a   : > { %680 = vmatpush.bf16.msra.mxu1 %v2210_v18  ;;  %708 = vmatpush.bf16.msra.mxu3 %v2214_v19  ;;  %v412_v4 = vshll.u32 %v3219_v59, 16  ;;  %v424_v7 = vshll.u32 %v3221_v60, 16  ;;  %v2332_v12 = vld [vmem:[#allocation3 + $0x78] sm:$0xf]  ;;  %v409_v14 = vrot.slane %v407_v0, 1  ;;  %v2170_v23 = vor.u32 %v2762_v2, %v2169_v1  ;;  %s2708_s11 = sshll.u32 %s3192_s26, 4 }
  0x3b   : > { %693 = vmatpush.bf16.msra.mxu2 %v2130_v22  ;;  %vm403_vm1 = vsmask.f32 7424  ;;  %v421_v16 = vrot.slane %v419_v6, 1  ;;  %v2725_v18 = vld [vmem:[#allocation3 + $0x80] sm:$0xf0]  ;;  %v2242_v24 = vor.u32 %v2780_v11, %v2241_v3  ;;  %vm1538_vm4 = vcmask 130052   ;;  %s3314_s14 = scalar_lea.vmem %s3428_s1, %s2708_s11 }
  0x3c   : > { %v414_v15 = vrot.slane %v412_v4, 1  ;;  %v426_v17 = vrot.slane %v424_v7, 1  ;;  %v2404_v19 = vld [vmem:[#allocation3 + $0x108] sm:$0xf]  ;;  %v2743_v20 = vld [vmem:[#allocation3 + $0x110] sm:$0xf0]  ;;  %v410_v21 = vor.u32 %v409_v14, %v405_v63  ;;  %v2333_v28 = vor.u32 %v2725_v18, %v2332_v12  ;;  %vm1539_vm6 = vmor %vm1538_vm4, %vm649_vm0 }
  0x3d   : > { %666 = vmatpush.bf16.msra.mxu0 %v2114_v36  ;;  %v422_v22 = vor.u32 %v421_v16, %v417_v5  ;;  %v2759_v27 = vld [vmem:[#allocation3 + $0x19c] sm:$0xf0]  ;;  %v2405_v29 = vor.u32 %v2743_v20, %v2404_v19  ;;  %v2229_v30 = vld [vmem:[#allocation3 + $0x224] sm:$0xf]  ;;  %v2777_v31 = vld [vmem:[#allocation3 + $0x22c] sm:$0xf0] }
  0x3e   : > { %715 = vmatpush.bf16.msrb.mxu1 %v2206_v26  ;;  %731 = vmatpush.bf16.msrb.mxu3 %v657_v32  ;;  %v3231_v25 = vsel %vm403_vm1, %v410_v21, %v414_v15  ;;  %v2157_v26 = vld [vmem:[#allocation3 + $0x194] sm:$0xf]  ;;  %v2320_v32 = vld [vmem:[#allocation3 + $0x60] sm:$0xf]  ;;  %v2722_v34 = vld [vmem:[#allocation3 + $0x68] sm:$0xf0]  ;;  %v2230_v39 = vor.u32 %v2777_v31, %v2229_v30 }
  0x3f   : > { %694 = vmatpush.bf16.msra.mxu2 %v2118_v43  ;;  %v3234_v33 = vsel %vm403_vm1, %v422_v22, %v426_v17  ;;  %v2392_v36 = vld [vmem:[#allocation3 + $0xf0] sm:$0xf]  ;;  %v2740_v37 = vld [vmem:[#allocation3 + $0xf8] sm:$0xf0]  ;;  %v2158_v38 = vor.u32 %v2759_v27, %v2157_v26  ;;  %v2756_v43 = vld [vmem:[#allocation3 + $0x184] sm:$0xf0] }
  0x40   : > { %667 = vmatmul.bf16.vlgmr.msra.gmra.mxu0 %v3231_v25  ;;  %2268 = vmatmul.msk.bf16.vlgmr.msra.gmra.mxu3 %vm645_vm2, %v3234_v33  ;;  %v2145_v40 = vld [vmem:[#allocation3 + $0x17c] sm:$0xf]  ;;  %v2393_v45 = vor.u32 %v2740_v37, %v2392_v36  ;;  %v2217_v46 = vld [vmem:[#allocation3 + $0x20c] sm:$0xf]  ;;  %v2774_v47 = vld [vmem:[#allocation3 + $0x214] sm:$0xf0] }
  0x41   : > { %971 = vmatpush.bf16.msrb.mxu0 %v2357_v55  ;;  %2267 = vmatmul.msk.bf16.vlgmr.msra.gmra.mxu1 %vm645_vm2, %v3234_v33  ;;  %v2308_v48 = vld [vmem:[#allocation3 + $0x48] sm:$0xf]  ;;  %v2380_v50 = vld [vmem:[#allocation3 + $0xd8] sm:$0xf]  ;;  %v2737_v51 = vld [vmem:[#allocation3 + $0xe0] sm:$0xf0]  ;;  %v2146_v56 = vor.u32 %v2756_v43, %v2145_v40  ;;  %v2218_v57 = vor.u32 %v2774_v47, %v2217_v46 }
  0x42   : > { %716 = vmatpush.bf16.msrb.mxu1 %v2194_v44  ;;  %732 = vmatpush.bf16.msrb.mxu3 %v2266_v49  ;;  %v2321_v44 = vor.u32 %v2722_v34, %v2320_v32  ;;  %v2719_v49 = vld [vmem:[#allocation3 + $0x50] sm:$0xf0]  ;;  %v2730_v52 = vld [vmem:[#allocation3 + $0xac] sm:$0xf]  ;;  %v2358_v55 = vld [vmem:[#allocation3 + $0xb4] sm:$0xf0]  ;;  %v2381_v63 = vor.u32 %v2737_v51, %v2380_v50 }
  0x43   : > { %987 = vmatpush.bf16.msrb.mxu2 %v963_v61  ;;  %v2133_v58 = vld [vmem:[#allocation3 + $0x164] sm:$0xf]  ;;  %v877_v61 = vunpack.c.h.b16 %v3200_v13  ;;  %v2753_v0 = vld [vmem:[#allocation3 + $0x16c] sm:$0xf0]  ;;  %v2716_v2 = vld [vmem:[#allocation3 + $0x38] sm:$0xf0]  ;;  %v2361_v3 = vor.u32 %v2730_v52, %v2358_v55 }
  0x44   : > { %695 = vmatmul.bf16.vlgmr.msra.gmra.mxu2 %v3231_v25  ;;  %v2296_v1 = vld [vmem:[#allocation3 + $0x30] sm:$0xf]  ;;  %v2368_v4 = vld [vmem:[#allocation3 + $0xc0] sm:$0xf]  ;;  %v2734_v5 = vld [vmem:[#allocation3 + $0xc8] sm:$0xf0] }
  0x45   : > { %972 = vmatpush.bf16.msrb.mxu0 %v2345_v9  ;;  %v2727_v6 = vld [vmem:[#allocation3 + $0x94] sm:$0xf]  ;;  %v2346_v7 = vld [vmem:[#allocation3 + $0x9c] sm:$0xf0]  ;;  %v2732_v9 = vld [vmem:[#allocation3 + $0xb8] sm:$0xf0]  ;;  %v2297_v13 = vor.u32 %v2716_v2, %v2296_v1  ;;  %v2369_v11 = vor.u32 %v2734_v5, %v2368_v4  ;;  %v919_v15 = vpack.c.b16 %v877_v61, %v877_v61 }
  0x46   : > { %717 = vmatpush.bf16.msrb.mxu1 %v2182_v62  ;;  %733 = vmatpush.bf16.msrb.mxu3 %v2254_v8  ;;  %v2309_v62 = vor.u32 %v2719_v49, %v2308_v48  ;;  %v2364_v8 = vld [vmem:[#allocation3 + $0xb0] sm:$0xf]  ;;  %v2121_v12 = vld [vmem:[#allocation3 + $0x14c] sm:$0xf]  ;;  %v2750_v14 = vld [vmem:[#allocation3 + $0x154] sm:$0xf0]  ;;  %v2349_v17 = vor.u32 %v2727_v6, %v2346_v7 }
  0x47   : > { %988 = vmatpush.bf16.msrb.mxu2 %v2417_v10  ;;  %v2134_v10 = vor.u32 %v2753_v0, %v2133_v58  ;;  %v333_v16 = vld [vmem:[#allocation3 + $0x140] sm:$0xf]  ;;  %v2365_v18 = vor.u32 %v2732_v9, %v2364_v8  ;;  %v2284_v19 = vld [vmem:[#allocation3 + $0x18] sm:$0xf]  ;;  %v2713_v20 = vld [vmem:[#allocation3 + $0x20] sm:$0xf0]  ;;  %v2122_v26 = vor.u32 %v2750_v14, %v2121_v12 }
  0x48   : > { %v2724_v21 = vld [vmem:[#allocation3 + $0x7c] sm:$0xf]  ;;  %v2334_v22 = vld [vmem:[#allocation3 + $0x84] sm:$0xf0]  ;;  %v878_v27 = vunpack.c.l.b16 %v333_v16  ;;  %v2272_v30 = vld [vmem:[#allocation3] sm:$0xf] }
  0x49   : > { %973 = vmatpush.bf16.msrb.mxu0 %v2333_v28  ;;  %v2285_v28 = vor.u32 %v2713_v20, %v2284_v19  ;;  %v2710_v31 = vld [vmem:[#allocation3 + $0x8] sm:$0xf0]  ;;  %v2337_v32 = vor.u32 %v2724_v21, %v2334_v22  ;;  %v2721_v36 = vld [vmem:[#allocation3 + $0x64] sm:$0xf]  ;;  %v2340_v40 = vld [vmem:[#allocation3 + $0x80] sm:$0xf] }
  0x4a   : > { %718 = vmatpush.bf16.msrb.mxu1 %v2170_v23  ;;  %734 = vmatpush.bf16.msrb.mxu3 %v2242_v24  ;;  %v2352_v23 = vld [vmem:[#allocation3 + $0x98] sm:$0xf]  ;;  %v2729_v24 = vld [vmem:[#allocation3 + $0xa0] sm:$0xf0]  ;;  %v2726_v43 = vld [vmem:[#allocation3 + $0x88] sm:$0xf0] }
  0x4b   : > { %989 = vmatpush.bf16.msrb.mxu2 %v2405_v29  ;;  %v966_v29 = vsel %vm649_vm0, %v919_v15, 0  ;;  %v2353_v34 = vor.u32 %v2729_v24, %v2352_v23  ;;  %v2745_v37 = vld [vmem:[#allocation3 + $0x124] sm:$0xf]  ;;  %v2341_v48 = vor.u32 %v2726_v43, %v2340_v40  ;;  %v2718_v49 = vld [vmem:[#allocation3 + $0x4c] sm:$0xf]  ;;  %s3081_s15 = smov 8  }
  0x4c   : > { %v2742_v50 = vld [vmem:[#allocation3 + $0x10c] sm:$0xf]  ;;  %v2406_v51 = vld [vmem:[#allocation3 + $0x114] sm:$0xf0]  ;;  %v2328_v55 = vld [vmem:[#allocation3 + $0x68] sm:$0xf] }
  0x4d   : > { %974 = vmatpush.bf16.msrb.mxu0 %v2321_v44  ;;  %v920_v44 = vpack.c.b16 %v878_v27, %v878_v27  ;;  %v2310_v52 = vld [vmem:[#allocation3 + $0x54] sm:$0xf0]  ;;  %v2747_v58 = vld [vmem:[#allocation3 + $0x130] sm:$0xf0]  ;;  %v2409_v61 = vor.u32 %v2742_v50, %v2406_v51  ;;  %v2394_v2 = vld [vmem:[#allocation3 + $0xfc] sm:$0xf0] }
  0x4e   : > { %719 = vmatpush.bf16.msrb.mxu1 %v2158_v38  ;;  %735 = vmatpush.bf16.msrb.mxu3 %v2230_v39  ;;  %v2418_v38 = vld [vmem:[#allocation3 + $0x12c] sm:$0xf0]  ;;  %v2715_v0 = vld [vmem:[#allocation3 + $0x34] sm:$0xf]  ;;  %v2298_v4 = vld [vmem:[#allocation3 + $0x3c] sm:$0xf0] }
  0x4f   : > { %990 = vmatpush.bf16.msrb.mxu2 %v2393_v45  ;;  %v2322_v39 = vld [vmem:[#allocation3 + $0x6c] sm:$0xf0]  ;;  %v2273_v45 = vor.u32 %v2710_v31, %v2272_v30  ;;  %v2421_v46 = vor.u32 %v2745_v37, %v2418_v38  ;;  %v2739_v1 = vld [vmem:[#allocation3 + $0xf4] sm:$0xf]  ;;  %v2720_v6 = vld [vmem:[#allocation3 + $0x58] sm:$0xf0] }
  0x50   : > { %v2325_v47 = vor.u32 %v2721_v36, %v2322_v39  ;;  %v2316_v5 = vld [vmem:[#allocation3 + $0x50] sm:$0xf]  ;;  %v2744_v7 = vld [vmem:[#allocation3 + $0x118] sm:$0xf0]  ;;  %v2397_v8 = vor.u32 %v2739_v1, %v2394_v2  ;;  %v3251_v9 = vld [vmem:[#allocation3 + $0x3c0] sm:$0xff]  ;;  %v1118_v2 = vrot.slane %v3219_v59, 1 }
  0x51   : > { %975 = vmatpush.bf16.msrb.mxu0 %v2309_v62  ;;  %v2313_v62 = vor.u32 %v2718_v49, %v2310_v52  ;;  %v2736_v12 = vld [vmem:[#allocation3 + $0xdc] sm:$0xf]  ;;  %v2382_v14 = vld [vmem:[#allocation3 + $0xe4] sm:$0xf0]  ;;  %v2400_v19 = vld [vmem:[#allocation3 + $0xf8] sm:$0xf]  ;;  %v1256_v24 = vunpack.c.l.b16 %v3251_v9 }
  0x52   : > { %720 = vmatpush.bf16.msrb.mxu1 %v2146_v56  ;;  %736 = vmatpush.bf16.msrb.mxu3 %v2218_v57  ;;  %v2723_v56 = vld [vmem:[#allocation3 + $0x70] sm:$0xf0]  ;;  %v2424_v57 = vld [vmem:[#allocation3 + $0x128] sm:$0xf]  ;;  %v2741_v20 = vld [vmem:[#allocation3 + $0x100] sm:$0xf0]  ;;  %v2385_v21 = vor.u32 %v2736_v12, %v2382_v14 }
  0x53   : > { %991 = vmatpush.bf16.msrb.mxu2 %v2381_v63  ;;  %v2329_v63 = vor.u32 %v2723_v56, %v2328_v55  ;;  %v2286_v16 = vld [vmem:[#allocation3 + $0x24] sm:$0xf0]  ;;  %v2709_v22 = vld [vmem:[#allocation3 + $0x4] sm:$0xf]  ;;  %v2274_v23 = vld [vmem:[#allocation3 + $0xc] sm:$0xf0]  ;;  %v2401_v31 = vor.u32 %v2741_v20, %v2400_v19 }
  0x54   : > { %v2292_v30 = vld [vmem:[#allocation3 + $0x20] sm:$0xf]  ;;  %v1055_v36 = vld [vmem:[%s3198_s8] sm:$0xee]  ;;  %v2515_v38 = vld [vmem:[#allocation3 + $0x330] sm:$0xf]  ;;  %v2277_v49 = vor.u32 %v2709_v22, %v2274_v23 }
  0x55   : > { %976 = vmatpush.bf16.msrb.mxu0 %v2297_v13  ;;  %2269 = vmatmul.msk.bf16.vlgmr.msrb.gmra.mxu3 %vm645_vm2, %v3234_v33  ;;  %v969_v33 = vsel %vm649_vm0, %v920_v44, 0  ;;  %v2317_v13 = vor.u32 %v2720_v6, %v2316_v5  ;;  %v2738_v37 = vld [vmem:[#allocation3 + $0xe8] sm:$0xf0]  ;;  %v2809_v39 = vld [vmem:[#allocation3 + $0x338] sm:$0xf0]  ;;  %v1113_v40 = vunpack.c.h.b16 %v1055_v36  ;;  %v1298_v44 = vpack.c.b16 %v1256_v24, %v1256_v24  ;;  %s264_s16 = sand.u32 1, %s3064_s19  }
  0x56   : > { %999 = vmatpush.bf16.msra.mxu3 %v2361_v3  ;;  %721 = vmatpush.bf16.msrb.mxu1 %v2134_v10  ;;  %v2425_v3 = vor.u32 %v2747_v58, %v2424_v57  ;;  %v2301_v10 = vor.u32 %v2715_v0, %v2298_v4  ;;  %v2376_v51 = vld [vmem:[#allocation3 + $0xc8] sm:$0xf]  ;;  %v2735_v52 = vld [vmem:[#allocation3 + $0xd0] sm:$0xf0]  ;;  %v1121_v56 = vrot.slane %v3221_v60, 1  ;;  %v2516_v57 = vor.u32 %v2809_v39, %v2515_v38  ;;  %s2107_s17 = sshll.u32 %s264_s16, 4 }
  0x57   : > { %992 = vmatpush.bf16.msrb.mxu2 %v2369_v11  ;;  %v2712_v11 = vld [vmem:[#allocation3 + $0x1c] sm:$0xf]  ;;  %v1115_v55 = vpack.c.b16 %v396_v42, %v1113_v40  ;;  %v2503_v58 = vld [vmem:[#allocation3 + $0x318] sm:$0xf]  ;;  %v2824_v0 = vld [vmem:[#allocation3 + $0x3b0] sm:$0xf0]  ;;  %v2377_v35 = vor.u32 %v2735_v52, %v2376_v51 }
  0x58   : > { %v2808_v42 = vld [vmem:[#allocation3 + $0x334] sm:$0xf]  ;;  %v2517_v4 = vld [vmem:[#allocation3 + $0x33c] sm:$0xf0]  ;;  %v2805_v12 = vld [vmem:[#allocation3 + $0x31c] sm:$0xf] }
  0x59   : > { %977 = vmatpush.bf16.msrb.mxu0 %v2285_v28  ;;  %v2733_v28 = vld [vmem:[#allocation3 + $0xc4] sm:$0xf]  ;;  %v1120_v1 = vrot.slane %v1115_v55, 1  ;;  %v2505_v14 = vld [vmem:[#allocation3 + $0x324] sm:$0xf0]  ;;  %s2853_s23 = sshll.u32 %s3134_s22, 4 }
  0x5a   : > { %1000 = vmatpush.bf16.msra.mxu3 %v2349_v17  ;;  %722 = vmatpush.bf16.msrb.mxu1 %v2122_v26  ;;  %v2304_v17 = vld [vmem:[#allocation3 + $0x38] sm:$0xf]  ;;  %v2289_v26 = vor.u32 %v2712_v11, %v2286_v16  ;;  %v2821_v11 = vld [vmem:[#allocation3 + $0x398] sm:$0xf0]  ;;  %v2823_v16 = vld [vmem:[#allocation3 + $0x3ac] sm:$0xf]  ;;  %v2508_v20 = vor.u32 %v2805_v12, %v2505_v14  ;;  %s1999_s6 = scalar_lea.hbm %s3432_s5, %s2853_s23 }
  0x5b   : > { %1027 = vmatpush.bf16.msra.mxu2 %v2365_v18  ;;  %v2717_v18 = vld [vmem:[#allocation3 + $0x40] sm:$0xf0]  ;;  %v2800_v22 = vld [vmem:[#allocation3 + $0x2f0] sm:$0xf0]  ;;  %v2551_v23 = vld [vmem:[#allocation3 + $0x378] sm:$0xf] }
  0x5c   : > { %2426 = vmatmul.msk.bf16.vlgmr.msrb.gmra.mxu2 %vm645_vm2, %v3217_v54  ;;  %v2305_v27 = vor.u32 %v2717_v18, %v2304_v17  ;;  %v2577_v17 = vld [vmem:[#allocation3 + $0x3b4] sm:$0xf0]  ;;  %v2539_v38 = vld [vmem:[#allocation3 + $0x360] sm:$0xf]  ;;  %v2815_v40 = vld [vmem:[#allocation3 + $0x368] sm:$0xf0] }
  0x5d   : > { %723 = vmatmul.bf16.vlgmr.msrb.gmra.mxu1 %v3231_v25  ;;  %978 = vmatpush.bf16.msrb.mxu0 %v2273_v45  ;;  %v2412_v25 = vld [vmem:[#allocation3 + $0x110] sm:$0xf]  ;;  %v2280_v45 = vld [vmem:[#allocation3 + $0x8] sm:$0xf]  ;;  %v2580_v24 = vor.u32 %v2823_v16, %v2577_v17  ;;  %v2812_v51 = vld [vmem:[#allocation3 + $0x350] sm:$0xf0] }
  0x5e   : > { %1015 = vmatpush.bf16.msra.mxu1 %v966_v29  ;;  %1001 = vmatpush.bf16.msra.mxu3 %v2337_v32  ;;  %v2413_v15 = vor.u32 %v2744_v7, %v2412_v25  ;;  %v2370_v29 = vld [vmem:[#allocation3 + $0xcc] sm:$0xf0]  ;;  %v2714_v32 = vld [vmem:[#allocation3 + $0x28] sm:$0xf0]  ;;  %v3264_v25 = vsel %vm1116_vm3, %v1120_v1, %v1121_v56  ;;  %v2796_v55 = vld [vmem:[#allocation3 + $0x2d4] sm:$0xf] }
  0x5f   : > { %1028 = vmatpush.bf16.msra.mxu2 %v2353_v34  ;;  %v2388_v34 = vld [vmem:[#allocation3 + $0xe0] sm:$0xf]  ;;  %v2373_v43 = vor.u32 %v2733_v28, %v2370_v29  ;;  %v2293_v50 = vor.u32 %v2714_v32, %v2292_v30  ;;  %v2493_v28 = vld [vmem:[#allocation3 + $0x30c] sm:$0xf0]  ;;  %v2820_v29 = vld [vmem:[#allocation3 + $0x394] sm:$0xf] }
  0x60   : > { %979 = vmatmul.bf16.vlgmr.msrb.gmra.mxu0 %v3213_v53  ;;  %v2565_v30 = vld [vmem:[#allocation3 + $0x39c] sm:$0xf0]  ;;  %v2445_v16 = vld [vmem:[#allocation3 + $0x2ac] sm:$0xf0]  ;;  %v2499_v17 = vld [vmem:[#allocation3 + $0x308] sm:$0xf] }
  0x61   : > { %1043 = vmatpush.bf16.msra.mxu0 %v969_v33  ;;  %v2389_v33 = vor.u32 %v2738_v37, %v2388_v34  ;;  %v2797_v37 = vld [vmem:[#allocation3 + $0x2d8] sm:$0xf0]  ;;  %v2568_v39 = vor.u32 %v2820_v29, %v2565_v30  ;;  %v2469_v56 = vld [vmem:[#allocation3 + $0x2dc] sm:$0xf0]  ;;  %v2583_v29 = vld [vmem:[#allocation3 + $0x3b0] sm:$0xf] }
  0x62   : > { %1016 = vmatpush.bf16.msra.mxu1 %v2421_v46  ;;  %1002 = vmatpush.bf16.msra.mxu3 %v2325_v47  ;;  %v2711_v46 = vld [vmem:[#allocation3 + $0x10] sm:$0xf0]  ;;  %v1257_v47 = vunpack.c.h.b16 %v3251_v9  ;;  %v2491_v9 = vld [vmem:[#allocation3 + $0x300] sm:$0xf]  ;;  %v2472_v1 = vor.u32 %v2796_v55, %v2469_v56  ;;  %v2825_v30 = vld [vmem:[#allocation3 + $0x3b8] sm:$0xf0] }
  0x63   : > { %1029 = vmatpush.bf16.msra.mxu2 %v2341_v48  ;;  %v1112_v48 = vunpack.c.l.b16 %v1055_v36  ;;  %v2281_v5 = vor.u32 %v2711_v46, %v2280_v45  ;;  %v2467_v36 = vld [vmem:[#allocation3 + $0x2d0] sm:$0xf]  ;;  %v2553_v45 = vld [vmem:[#allocation3 + $0x384] sm:$0xf0]  ;;  %v2455_v46 = vld [vmem:[#allocation3 + $0x2b8] sm:$0xf] }
  0x64   : > { %v1299_v6 = vpack.c.b16 %v1257_v47, %v1257_v47  ;;  %v2540_v47 = vor.u32 %v2815_v40, %v2539_v38  ;;  %v2571_v38 = vld [vmem:[#allocation3 + $0x398] sm:$0xf]  ;;  %v2439_v55 = vld [vmem:[#allocation3 + $0x290] sm:$0xf]  ;;  %s266_s25 = scalar_lea.vmem [#allocation8], %s2107_s17  ;;  %s2002_s8 = sshll.u32 %s1999_s6, 4  ;;  %s2003_s8 = int_to_ptr.hbm [resolvable:$true] %s2002_s8 }
  0x65   : > { %1044 = vmatpush.bf16.msra.mxu0 %v2425_v3  ;;  %v1344_v3 = vsel %vm649_vm0, %v1298_v44, 0  ;;  %v2481_v44 = vld [vmem:[#allocation3 + $0x2f4] sm:$0xf0]  ;;  %s2000_s7 = sshll.u32 %s266_s25, 4  ;;  %s1988_s22 = scalar_lea.sflag [#allocation5], %s264_s16  ;;  %s2001_s7 = int_to_ptr.vmem [resolvable:$true] %s2000_s7 }
  0x66   : > { %1017 = vmatpush.bf16.msra.mxu1 %v2409_v61  ;;  %1003 = vmatpush.bf16.msra.mxu3 %v2313_v62  ;;  %v2806_v61 = vld [vmem:[#allocation3 + $0x320] sm:$0xf0]  ;;  %v1114_v62 = vpack.c.b16 %v395_v41, %v1112_v48  ;;  %s3016_s9 = sshra.s32 %s2003_s8, 4  ;;  %s3022_s13 = scalar_lea.hbm %s3432_s5, 32  ;;  %s3017_s9 = int_to_ptr.hbm [resolvable:$true] %s3016_s9 }
  0x67   : > { %1030 = vmatpush.bf16.msra.mxu2 %v2329_v63  ;;  %v2575_v63 = vld [vmem:[#allocation3 + $0x3a8] sm:$0xf]  ;;  %v2504_v41 = vor.u32 %v2806_v61, %v2503_v58  ;;  %v2523_v58 = vld [vmem:[#allocation3 + $0x338] sm:$0xf]  ;;  %v2810_v61 = vld [vmem:[#allocation3 + $0x340] sm:$0xf0]  ;;  %p3023_p3 = scmp.lt.s32.totalorder %s3017_s9, %s3432_s5 }
  0x68   : > { %v1117_v60 = vrot.slane %v1114_v62, 1  ;;  %v2576_v59 = vor.u32 %v2824_v0, %v2575_v63  ;;  %v1110_v63 = vld [vmem:[#allocation3 + $0x3c8] sm:$0xf]  ;;  %s3018_s10 = scalar_lea.hbm %s3017_s9, 16 }
  0x69   : > { %1045 = vmatpush.bf16.msra.mxu0 %v2413_v15  ;;  %v1347_v15 = vsel %vm649_vm0, %v1299_v6, 0  ;;  %v2811_v6 = vld [vmem:[#allocation3 + $0x34c] sm:$0xf]  ;;  %p3019_p0 = scmp.ne.s32.totalorder %s3017_s9, %s3018_s10  ;;  %p3024_p4 = scmp.lt.s32.totalorder %s3022_s13, %s3018_s10 }
  0x6a   : > { %1018 = vmatpush.bf16.msra.mxu1 %v2397_v8  ;;  %1004 = vmatpush.bf16.msra.mxu3 %v2301_v10  ;;  %v3267_v7 = vsel %vm1116_vm3, %v1117_v60, %v1118_v2  ;;  %v2520_v8 = vor.u32 %v2808_v42, %v2517_v4  ;;  %v2803_v10 = vld [vmem:[#allocation3 + $0x308] sm:$0xf0]  ;;  %v2443_v2 = vld [vmem:[#allocation3 + $0x2a0] sm:$0xf]  ;;  %v2524_v4 = vor.u32 %v2810_v61, %v2523_v58  ;;  %v2793_v60 = vld [vmem:[#allocation3 + $0x2bc] sm:$0xf] }
  0x6b   : > { %1031 = vmatpush.bf16.msra.mxu2 %v2317_v13  ;;  %v2563_v13 = vld [vmem:[#allocation3 + $0x390] sm:$0xf]  ;;  %v2492_v18 = vor.u32 %v2803_v10, %v2491_v9  ;;  %v2813_v58 = vld [vmem:[#allocation3 + $0x358] sm:$0xf0]  ;;  %p3020_p1 = pnand %p3019_p0, %p3151_p5  ;;  %p3025_p7 = por %p3024_p4, %p3023_p3 }
  0x6c   : > { %v2564_v19 = vor.u32 %v2821_v11, %v2563_v13  ;;  %v2431_v13 = vld [vmem:[#allocation3 + $0x288] sm:$0xf]  ;;  %v2788_v11 = vld [vmem:[#allocation3 + $0x290] sm:$0xf0] }
  0x6d   : > { %1046 = vmatpush.bf16.msra.mxu0 %v2401_v31  ;;  %p3021_p2 = pneg %p3020_p1 }
  0x6e   : > { %1019 = vmatpush.bf16.msra.mxu1 %v2385_v21  ;;  %1005 = vmatpush.bf16.msra.mxu3 %v2289_v26  ;;  %v2479_v21 = vld [vmem:[#allocation3 + $0x2e8] sm:$0xf]  ;;  %v2818_v26 = vld [vmem:[#allocation3 + $0x380] sm:$0xf0] }
  0x6f   : > { %1032 = vmatpush.bf16.msra.mxu2 %v2305_v27  ;;  %v2802_v27 = vld [vmem:[#allocation3 + $0x304] sm:$0xf]  ;;  %v2480_v31 = vor.u32 %v2800_v22, %v2479_v21  ;;  %v2552_v32 = vor.u32 %v2818_v26, %v2551_v23  ;;  %v2787_v22 = vld [vmem:[#allocation3 + $0x28c] sm:$0xf]  ;;  %v2487_v26 = vld [vmem:[#allocation3 + $0x2f0] sm:$0xf]  ;;  %p3026_p8 = pnand %p3025_p7, %p3021_p2 }
  0x70   : > { %v2496_v34 = vor.u32 %v2802_v27, %v2493_v28  ;;  %v2801_v27 = vld [vmem:[#allocation3 + $0x2f8] sm:$0xf0] }
  0x71   : > { %1047 = vmatpush.bf16.msra.mxu0 %v2389_v33  ;;  %v2814_v33 = vld [vmem:[#allocation3 + $0x364] sm:$0xf] }
  0x72   : > { %1020 = vmatpush.bf16.msra.mxu1 %v2373_v43  ;;  %1006 = vmatpush.bf16.msra.mxu3 %v2277_v49  ;;  %v2799_v43 = vld [vmem:[#allocation3 + $0x2ec] sm:$0xf]  ;;  %v2794_v49 = vld [vmem:[#allocation3 + $0x2c0] sm:$0xf0] }
  0x73   : > { %1033 = vmatpush.bf16.msra.mxu2 %v2293_v50  ;;  %v2484_v48 = vor.u32 %v2799_v43, %v2481_v44  ;;  %v2527_v50 = vld [vmem:[#allocation3 + $0x348] sm:$0xf]  ;;  %v2456_v62 = vor.u32 %v2794_v49, %v2455_v46  ;;  %v2463_v43 = vld [vmem:[#allocation3 + $0x2c0] sm:$0xf]  ;;  %v2792_v49 = vld [vmem:[#allocation3 + $0x2b0] sm:$0xf0] }
  0x74   : > { %v2528_v0 = vor.u32 %v2812_v51, %v2527_v50  ;;  %v2547_v50 = vld [vmem:[#allocation3 + $0x368] sm:$0xf]  ;;  %v2816_v51 = vld [vmem:[#allocation3 + $0x370] sm:$0xf0] }
  0x75   : > { %2427 = vmatmul.msk.bf16.vlgmr.msra.gmra.mxu1 %vm645_vm2, %v3217_v54  ;;  %1007 = vmatmul.bf16.vlgmr.msra.gmra.mxu3 %v3213_v53  ;;  %v2548_v56 = vor.u32 %v2816_v51, %v2547_v50 }
  0x76   : > { %1352 = vmatpush.bf16.msrb.mxu1 %v2516_v57  ;;  %1368 = vmatpush.bf16.msrb.mxu3 %v1344_v3  ;;  %v2541_v57 = vld [vmem:[#allocation3 + $0x36c] sm:$0xf0]  ;;  %v2791_v3 = vld [vmem:[#allocation3 + $0x2a8] sm:$0xf0] }
  0x77   : > { %1034 = vmatpush.bf16.msra.mxu2 %v2281_v5  ;;  %1048 = vmatpush.bf16.msra.mxu0 %v2377_v35  ;;  %v2544_v42 = vor.u32 %v2814_v33, %v2541_v57  ;;  %v2457_v5 = vld [vmem:[#allocation3 + $0x2c4] sm:$0xf0]  ;;  %v2529_v35 = vld [vmem:[#allocation3 + $0x354] sm:$0xf0]  ;;  %v2444_v9 = vor.u32 %v2791_v3, %v2443_v2  ;;  %v2789_v33 = vld [vmem:[#allocation3 + $0x298] sm:$0xf0] }
  0x78   : > { %v2460_v10 = vor.u32 %v2793_v60, %v2457_v5  ;;  %v2532_v12 = vor.u32 %v2811_v6, %v2529_v35  ;;  %v2535_v57 = vld [vmem:[#allocation3 + $0x350] sm:$0xf]  ;;  %v2440_v61 = vor.u32 %v2789_v33, %v2439_v55 }
  0x7a   : > { %1353 = vmatpush.bf16.msrb.mxu1 %v2504_v41  ;;  %1369 = vmatpush.bf16.msrb.mxu3 %v2576_v59  ;;  %v2511_v41 = vld [vmem:[#allocation3 + $0x320] sm:$0xf]  ;;  %v2807_v59 = vld [vmem:[#allocation3 + $0x328] sm:$0xf0] }
  0x7b   : > { %1380 = vmatpush.bf16.msrb.mxu0 %v2520_v8  ;;  %1396 = vmatpush.bf16.msrb.mxu2 %v1347_v15  ;;  %v1258_v8 = vunpack.c.l.b16 %v1110_v63  ;;  %v2512_v14 = vor.u32 %v2807_v59, %v2511_v41  ;;  %v2790_v15 = vld [vmem:[#allocation3 + $0x2a4] sm:$0xf] }
  0x7c   : > { %1035 = vmatmul.bf16.vlgmr.msra.gmra.mxu2 %v3213_v53  ;;  %2428 = vmatmul.msk.bf16.vlgmr.msra.gmra.mxu0 %vm645_vm2, %v3217_v54  ;;  %v2817_v53 = vld [vmem:[#allocation3 + $0x37c] sm:$0xf]  ;;  %v2468_v54 = vor.u32 %v2797_v37, %v2467_v36  ;;  %v2448_v21 = vor.u32 %v2790_v15, %v2445_v16  ;;  %v2584_v36 = vor.u32 %v2825_v30, %v2583_v29  ;;  %v2798_v37 = vld [vmem:[#allocation3 + $0x2e0] sm:$0xf0]  ;;  %v3293_v30 = vld [vmem:[%s3431_s4] sm:$0x7] }
  0x7d   : > { %v2556_v52 = vor.u32 %v2817_v53, %v2553_v45  ;;  %v2795_v53 = vld [vmem:[#allocation3 + $0x2c8] sm:$0xf0]  ;;  %v2559_v45 = vld [vmem:[#allocation3 + $0x380] sm:$0xf] }
  0x7e   : > { %1354 = vmatpush.bf16.msrb.mxu1 %v2492_v18  ;;  %1370 = vmatpush.bf16.msrb.mxu3 %v2564_v19  ;;  %v2804_v18 = vld [vmem:[#allocation3 + $0x310] sm:$0xf0]  ;;  %v1300_v19 = vpack.c.b16 %v1258_v8, %v1258_v8  ;;  %v2464_v46 = vor.u32 %v2795_v53, %v2463_v43 }
  0x7f   : > { %1381 = vmatpush.bf16.msrb.mxu0 %v2508_v20  ;;  %1397 = vmatpush.bf16.msrb.mxu2 %v2580_v24  ;;  %v2432_v20 = vor.u32 %v2788_v11, %v2431_v13  ;;  %v2500_v23 = vor.u32 %v2804_v18, %v2499_v17  ;;  %v2433_v24 = vld [vmem:[#allocation3 + $0x294] sm:$0xf0] }
  0x80   : > { %v1350_v28 = vsel %vm649_vm0, %v1300_v19, 0 }
  0x82   : > { %1355 = vmatpush.bf16.msrb.mxu1 %v2480_v31  ;;  %1371 = vmatpush.bf16.msrb.mxu3 %v2552_v32  ;;  %v2436_v31 = vor.u32 %v2787_v22, %v2433_v24  ;;  %v2488_v32 = vor.u32 %v2801_v27, %v2487_v26 }
  0x83   : > { %1382 = vmatpush.bf16.msrb.mxu0 %v2496_v34  ;;  %1398 = vmatpush.bf16.msrb.mxu2 %v2568_v39  ;;  %v2475_v34 = vld [vmem:[#allocation3 + $0x2d8] sm:$0xf]  ;;  %v2822_v39 = vld [vmem:[#allocation3 + $0x3a0] sm:$0xf0] }
  0x84   : > { %v2476_v40 = vor.u32 %v2798_v37, %v2475_v34  ;;  %v2572_v44 = vor.u32 %v2822_v39, %v2571_v38  ;;  %v1444_v37 = vperm.slane %v3293_v30, 0 }
  0x86   : > { %1356 = vmatpush.bf16.msrb.mxu1 %v2468_v54  ;;  %1372 = vmatpush.bf16.msrb.mxu3 %v2540_v47  ;;  %v2819_v54 = vld [vmem:[#allocation3 + $0x388] sm:$0xf0]  ;;  %v2451_v47 = vld [vmem:[#allocation3 + $0x2a8] sm:$0xf] }
  0x87   : > { %1383 = vmatpush.bf16.msrb.mxu0 %v2484_v48  ;;  %1399 = vmatpush.bf16.msrb.mxu2 %v2556_v52  ;;  %v2560_v48 = vor.u32 %v2819_v54, %v2559_v45  ;;  %v2452_v52 = vor.u32 %v2792_v49, %v2451_v47  ;;  %v1445_v54 = vperm.slane %v3293_v30, 1 }
  0x8a   : > { %1357 = vmatpush.bf16.msrb.mxu1 %v2456_v62  ;;  %1373 = vmatpush.bf16.msrb.mxu3 %v2528_v0  ;;  %v2536_v62 = vor.u32 %v2813_v58, %v2535_v57 }
  0x8b   : > { %1384 = vmatpush.bf16.msrb.mxu0 %v2472_v1  ;;  %1400 = vmatpush.bf16.msrb.mxu2 %v2544_v42 }
  0x8d   : > { %2585 = vmatmul.msk.bf16.vlgmr.msrb.gmra.mxu3 %vm645_vm2, %v3264_v25 }
  0x8e   : > { %1408 = vmatpush.bf16.msra.mxu3 %v2524_v4  ;;  %1358 = vmatpush.bf16.msrb.mxu1 %v2444_v9 }
  0x8f   : > { %1385 = vmatpush.bf16.msrb.mxu0 %v2460_v10  ;;  %1401 = vmatpush.bf16.msrb.mxu2 %v2532_v12 }
  0x92   : > { %1409 = vmatpush.bf16.msra.mxu3 %v2512_v14  ;;  %1359 = vmatpush.bf16.msrb.mxu1 %v2432_v20 }
  0x93   : > { %2586 = vmatmul.msk.bf16.vlgmr.msrb.gmra.mxu2 %vm645_vm2, %v3264_v25  ;;  %1386 = vmatpush.bf16.msrb.mxu0 %v2448_v21 }
  0x95   : > { %1360 = vmatmul.bf16.vlgmr.msrb.gmra.mxu1 %v3267_v7 }
  0x96   : > { %1410 = vmatpush.bf16.msra.mxu3 %v2500_v23  ;;  %1424 = vmatpush.bf16.msra.mxu1 %v1350_v28 }
  0x97   : > { %1387 = vmatpush.bf16.msrb.mxu0 %v2436_v31 }
  0x9a   : > { %1411 = vmatpush.bf16.msra.mxu3 %v2488_v32  ;;  %1425 = vmatpush.bf16.msra.mxu1 %v2584_v36 }
  0x9b   : > { %1388 = vmatmul.bf16.vlgmr.msrb.gmra.mxu0 %v3267_v7 }
  0x9e   : > { %1412 = vmatpush.bf16.msra.mxu3 %v2476_v40  ;;  %1426 = vmatpush.bf16.msra.mxu1 %v2572_v44 }
  0xa2   : > { %1413 = vmatpush.bf16.msra.mxu3 %v2464_v46  ;;  %1427 = vmatpush.bf16.msra.mxu1 %v2560_v48 }
  0xa6   : > { %1414 = vmatpush.bf16.msra.mxu3 %v2452_v52  ;;  %1428 = vmatpush.bf16.msra.mxu1 %v2548_v56 }
  0xaa   : > { %1415 = vmatpush.bf16.msra.mxu3 %v2440_v61  ;;  %1429 = vmatpush.bf16.msra.mxu1 %v2536_v62 }
  0xad   : > { %1416 = vmatmul.bf16.vlgmr.msra.gmra.mxu3 %v3267_v7  ;;  %2587 = vmatmul.msk.bf16.vlgmr.msra.gmra.mxu1 %vm645_vm2, %v3264_v25 }
  0xbd   : > { %v668_v63 = vpop.f32.mrf.mxu0 }
  0xbe   : > { %v682_v0 = vpop.f32.mrf.mxu1 }
  0xbf   : > { %v683_v1 = vadd.f32 %v682_v0, %v668_v63 }
  0xc3   : > { %v710_v3 = vpop.f32.mrf.mxu3 }
  0xc5   : > { %v670_v42 = vpop.f32.mrf.mxu0 }
  0xc6   : > { %v684_v4 = vpop.f32.mrf.mxu1 }
  0xc7   : > { %v696_v2 = vpop.f32.mrf.mxu2  ;;  %v685_v60 = vadd.f32 %v684_v4, %v670_v42 }
  0xc8   : > { %v711_v32 = vadd.f32 %v710_v3, %v696_v2 }
  0xcb   : > { %v712_v6 = vpop.f32.mrf.mxu3 }
  0xcf   : > { %v698_v5 = vpop.f32.mrf.mxu2 }
  0xd0   : > { %v713_v48 = vadd.f32 %v712_v6, %v698_v5 }
  0xd8   : > { %v738_v41 = vpop.f32.mrf.mxu3 }
  0xda   : > { %v724_v35 = vpop.f32.mrf.mxu1 }
  0xdb   : > { %v739_v8 = vadd.f32 %v738_v41, %v724_v35 }
  0xdd   : > { %v980_v9 = vpop.f32.mrf.mxu0 }
  0xde   : > { %v981_v10 = vadd.f32 %v980_v9, %v683_v1 }
  0xdf   : > { %v994_v59 = vpop.f32.mrf.mxu2 }
  0xe0   : > { %v995_v7 = vadd.f32 %v994_v59, %v981_v10  ;;  %v740_v13 = vpop.f32.mrf.mxu3  ;;  %v1446_v10 = vperm.slane %v3293_v30, 2 }
  0xe2   : > { %v726_v11 = vpop.f32.mrf.mxu1 }
  0xe3   : > { %v741_v25 = vadd.f32 %v740_v13, %v726_v11 }
  0xe5   : > { %v982_v12 = vpop.f32.mrf.mxu0 }
  0xe6   : > { %v983_v15 = vadd.f32 %v982_v12, %v685_v60  ;;  %v2851_v12 = vld [vmem:[#allocation6 + $0xc8] sm:$0xff] }
  0xe7   : > { %v996_v14 = vpop.f32.mrf.mxu2  ;;  %1943 = vmatpush.bf16.msrb.mxu3 %v2851_v12 }
  0xe8   : > { %v997_v16 = vadd.f32 %v996_v14, %v983_v15 }
  0xf2   : > { %v1022_v18 = vpop.f32.mrf.mxu1 }
  0xf8   : > { %v1008_v17 = vpop.f32.mrf.mxu3 }
  0xf9   : > { %v1050_v19 = vpop.f32.mrf.mxu0  ;;  %v1009_v38 = vadd.f32 %v1008_v17, %v711_v32 }
  0xfa   : > { %v1024_v27 = vpop.f32.mrf.mxu1 }
  0xfb   : > { %v1023_v53 = vadd.f32 %v1022_v18, %v1009_v38 }
  0xff   : > { %v1036_v20 = vpop.f32.mrf.mxu2 }
 0x100   : > { %v1037_v21 = vadd.f32 %v1036_v20, %v739_v8  ;;  %v1010_v24 = vpop.f32.mrf.mxu3 }
 0x101   : > { %v1052_v28 = vpop.f32.mrf.mxu0  ;;  %v1011_v52 = vadd.f32 %v1010_v24, %v713_v48 }
 0x102   : > { %v3286_v22 = vadd.f32 %v1050_v19, %v1037_v21  ;;  %v3080_v21 = vmov 0  }
 0x103   : > { %v1025_v62 = vadd.f32 %v1024_v27, %v1011_v52  ;;  %1540 = vst.msk [vmem:[#allocation2] sm:$0xff] %vm1539_vm6, %v3080_v21 }
 0x104   : > { %1541 = vst.msk [vmem:[#allocation2 + $0x8] sm:$0xff] %vm1539_vm6, %v3080_v21 }
 0x107   : > { %v1038_v23 = vpop.f32.mrf.mxu2 }
 0x108   : > { %v1039_v26 = vadd.f32 %v1038_v23, %v741_v25 }
 0x10a   : > { %v3288_v29 = vadd.f32 %v1052_v28, %v1039_v26 }
 0x110   : > { %v1375_v31 = vpop.f32.mrf.mxu3 }
 0x112   : > { %v1361_v34 = vpop.f32.mrf.mxu1 }
 0x113   : > { %v1376_v36 = vadd.f32 %v1375_v31, %v1361_v34  ;;  %v1456_v34 = vld [vmem:[%s3314_s14] sm:$0xff] }
 0x115   : > { %v1436_v39 = vadd.f32 %v1376_v36, %v995_v7 }
 0x116   : > { %v1403_v40 = vpop.f32.mrf.mxu2 }
 0x117   : > { %v1450_v43 = vadd.f32 %v1444_v37, %v1436_v39 }
 0x118   : > { %v1389_v44 = vpop.f32.mrf.mxu0  ;;  %v1377_v47 = vpop.f32.mrf.mxu3 }
 0x119   : > { %v1404_v45 = vadd.f32 %v1403_v40, %v1389_v44  ;;  %v2588_v46 = vmul.f32 -1.442695, %v1450_v43 }
 0x11a   : > { %v1363_v50 = vpop.f32.mrf.mxu1 }
 0x11b   : > { %v1437_v49 = vadd.f32 %v1404_v45, %v1023_v53  ;;  %2922 = vpow2.f32 %v2588_v46  ;;  %v1378_v51 = vadd.f32 %v1377_v47, %v1363_v50 }
 0x11d   : > { %v1451_v55 = vadd.f32 %v1445_v54, %v1437_v49  ;;  %v1439_v56 = vadd.f32 %v1378_v51, %v997_v16 }
 0x11e   : > { %v1405_v58 = vpop.f32.mrf.mxu2 }
 0x11f   : > { %v2590_v33 = vmul.f32 -1.442695, %v1451_v55  ;;  %v1453_v57 = vadd.f32 %v1444_v37, %v1439_v56 }
 0x120   : > { %v1391_v61 = vpop.f32.mrf.mxu0 }
 0x121   : > { %2924 = vpow2.f32 %v2590_v33  ;;  %v1406_v63 = vadd.f32 %v1405_v58, %v1391_v61  ;;  %v2923_v0 = vpop.eup %2922  ;;  %v2589_v1 = vmul.f32 -1.442695, %v1453_v57 }
 0x122   : > { %v1464_v2 = vadd.f32 1.0, %v2923_v0 }
 0x123   : > { %v1440_v3 = vadd.f32 %v1406_v63, %v1025_v62  ;;  %2926 = vpow2.f32 %v2589_v1 }
 0x124   : > { %2928 = vrcp.f32 %v1464_v2  ;;  %v1475_v11 = vand.u32 2147483647, %v1464_v2  ;;  %v1477_v25 = vand.u32 2147483648, %v1464_v2  ;;  %vm1471_vm7 = vweird.f32 %v1464_v2 }
 0x125   : > { %v1454_v42 = vadd.f32 %v1445_v54, %v1440_v3 }
 0x126   : > { %v1478_v27 = vor.u32 1.1754944e-38, %v1477_v25  ;;  %vm1476_vm9 = vcmp.eq.f32.partialorder %v1475_v11, 8.507059e+37 }
 0x127   : > { %v2925_v4 = vpop.eup %2924  ;;  %v2591_v60 = vmul.f32 -1.442695, %v1454_v42 }
 0x128   : > { %v3297_v5 = vadd.f32 1.0, %v2925_v4 }
 0x129   : > { %2930 = vpow2.f32 %v2591_v60  ;;  %v2927_v6 = vpop.eup %2926 }
 0x12a   : > { %2932 = vrcp.f32 %v3297_v5  ;;  %v2929_v35 = vpop.eup %2928  ;;  %v3300_v41 = vadd.f32 1.0, %v2927_v6  ;;  %v1431_v59 = vpop.f32.mrf.mxu1  ;;  %v1515_v26 = vand.u32 2147483648, %v3297_v5  ;;  %v1513_v37 = vand.u32 2147483647, %v3297_v5 }
 0x12b   : > { %v1467_v8 = vmul.f32 %v2929_v35, %v1464_v2  ;;  %vm1472_vm5 = vweird.f32 %v2929_v35  ;;  %vm1509_vm11 = vweird.f32 %v3297_v5 }
 0x12c   : > { %2934 = vrcp.f32 %v3300_v41  ;;  %vm1473_vm8 = vmor %vm1471_vm7, %vm1472_vm5  ;;  %v1516_v53 = vor.u32 1.1754944e-38, %v1515_v26  ;;  %v1490_v45 = vand.u32 2147483647, %v3300_v41  ;;  %v1492_v54 = vand.u32 2147483648, %v3300_v41  ;;  %v2847_v26 = vld [vmem:[#allocation6 + $0xa8] sm:$0xff] }
 0x12d   : > { %v1468_v9 = vsub.f32 1.0, %v1467_v8  ;;  %vm1514_vm14 = vcmp.eq.f32.partialorder %v1513_v37, 8.507059e+37  ;;  %vm1486_vm15 = vweird.f32 %v3300_v41  ;;  %v2845_v37 = vld [vmem:[#allocation6 + $0x98] sm:$0xff] }
 0x12e   : > { %vm1491_vm2 = vcmp.eq.f32.partialorder %v1490_v45, 8.507059e+37  ;;  %v1493_v58 = vor.u32 1.1754944e-38, %v1492_v54 }
 0x12f   : > { %v2931_v7 = vpop.eup %2930  ;;  %v1469_v17 = vmul.f32 %v2929_v35, %v1468_v9 }
 0x130   : > { %v1417_v13 = vpop.f32.mrf.mxu3  ;;  %v2933_v14 = vpop.eup %2932  ;;  %v3305_v15 = vadd.f32 1.0, %v2931_v7 }
 0x131   : > { %v1432_v16 = vadd.f32 %v1431_v59, %v1417_v13  ;;  %v1505_v18 = vmul.f32 %v2933_v14, %v3297_v5  ;;  %v1470_v20 = vadd.f32 %v2929_v35, %v1469_v17  ;;  %vm1510_vm10 = vweird.f32 %v2933_v14  ;;  %v2850_v17 = vld [vmem:[#allocation6 + $0xc0] sm:$0xff] }
 0x132   : > { %2936 = vrcp.f32 %v3305_v15  ;;  %v2935_v23 = vpop.eup %2934  ;;  %v1433_v32 = vpop.f32.mrf.mxu1  ;;  %vm1511_vm12 = vmor %vm1509_vm11, %vm1510_vm10  ;;  %v1528_v62 = vand.u32 2147483647, %v3305_v15  ;;  %v1530_v63 = vand.u32 2147483648, %v3305_v15  ;;  %vm1524_vm5 = vweird.f32 %v3305_v15  ;;  %1944 = vmatpush.bf16.msrb.mxu3 %v2850_v17 }
 0x133   : > { %v1438_v19 = vadd.f32 %v1432_v16, %v3286_v22  ;;  %v1506_v24 = vsub.f32 1.0, %v1505_v18  ;;  %v1482_v22 = vmul.f32 %v2935_v23, %v3300_v41  ;;  %v1474_v31 = vsel %vm1473_vm8, %v2929_v35, %v1470_v20  ;;  %v2842_v16 = vld [vmem:[#allocation6 + $0x80] sm:$0xff]  ;;  %v2841_v18 = vld [vmem:[#allocation6 + $0x78] sm:$0xff]  ;;  %v2840_v20 = vld [vmem:[#allocation6 + $0x70] sm:$0xff] }
 0x134   : > { %v3326_v38 = vsel %vm1476_vm9, %v1478_v27, %v1474_v31  ;;  %vm1487_vm13 = vweird.f32 %v2935_v23  ;;  %v1531_v30 = vor.u32 1.1754944e-38, %v1530_v63  ;;  %vm1529_vm7 = vcmp.eq.f32.partialorder %v1528_v62, 8.507059e+37  ;;  %1741 = vmatpush.bf16.msra.mxu2 %v2842_v16  ;;  %v2843_v27 = vld [vmem:[#allocation6 + $0x88] sm:$0xff]  ;;  %v2833_v31 = vld [vmem:[#allocation6 + $0x38] sm:$0xff] }
 0x135   : > { %v3322_v28 = vadd.f32 %v1446_v10, %v1438_v19  ;;  %v1507_v36 = vmul.f32 %v2933_v14, %v1506_v24  ;;  %v1483_v39 = vsub.f32 1.0, %v1482_v22  ;;  %v1977_v40 = vsub.f32 1.0, %v3326_v38  ;;  %vm1488_vm0 = vmor %vm1486_vm15, %vm1487_vm13  ;;  %v2849_v19 = vld [vmem:[#allocation6 + $0xb8] sm:$0xff]  ;;  %v2839_v24 = vld [vmem:[#allocation6 + $0x68] sm:$0xff]  ;;  %1762 = vmatpush.bf16.msra.mxu0 %v2843_v27 }
 0x136   : > { %vm1546_vm8 = vsmask.f32 256  ;;  %vm1547_vm9 = vsmask.f32 4368  ;;  %vm1542_vm11 = vcmask 1040384   ;;  %1945 = vmatpush.bf16.msrb.mxu3 %v2849_v19  ;;  %v2838_v22 = vld [vmem:[#allocation6 + $0x60] sm:$0xff] }
 0x137   : > { %v1508_v44 = vadd.f32 %v2933_v14, %v1507_v36  ;;  %v3332_v48 = vmul.f32 %v1977_v40, %v1456_v34  ;;  %v1484_v49 = vmul.f32 %v2935_v23, %v1483_v39  ;;  %vm1548_vm10 = vmor %vm1546_vm8, %vm1547_vm9  ;;  %v2832_v36 = vld [vmem:[#allocation6 + $0x30] sm:$0xff]  ;;  %v2831_v39 = vld [vmem:[#allocation6 + $0x28] sm:$0xff]  ;;  %vm1583_vm15 = vsmask.f32 7938 }
 0x138   : > { %v1419_v43 = vpop.f32.mrf.mxu3  ;;  %v2937_v46 = vpop.eup %2936  ;;  %1742 = vmatpush.bf16.msra.mxu2 %v2841_v18  ;;  %v2836_v40 = vld [vmem:[#allocation6 + $0x50] sm:$0xff]  ;;  %vm1596_vm9 = vcmask 1040448  }
 0x139   : > { %v1434_v47 = vadd.f32 %v1433_v32, %v1419_v43  ;;  %v1512_v50 = vsel %vm1511_vm12, %v2933_v14, %v1508_v44  ;;  %v1520_v51 = vmul.f32 %v2937_v46, %v3305_v15  ;;  %v1485_v56 = vadd.f32 %v2935_v23, %v1484_v49  ;;  %v2846_v32 = vld [vmem:[#allocation6 + $0xa0] sm:$0xff]  ;;  %1826 = vmatpush.bf16.msrb.mxu0 %v2833_v31  ;;  %v2844_v43 = vld [vmem:[#allocation6 + $0x90] sm:$0xff]  ;;  %v2835_v44 = vld [vmem:[#allocation6 + $0x48] sm:$0xff] }
 0x13a   : > { %v1517_v55 = vsel %vm1514_vm14, %v1516_v53, %v1512_v50  ;;  %vm1525_vm4 = vweird.f32 %v2937_v46  ;;  %vm1543_vm12 = vcmask 126980   ;;  %vm1582_vm14 = vcmask 1043520   ;;  %v2830_v53 = vld [vmem:[#allocation6 + $0x20] sm:$0xff]  ;;  %v2829_v50 = vld [vmem:[#allocation6 + $0x18] sm:$0xff] }
 0x13b   : > { %v1441_v52 = vadd.f32 %v1434_v47, %v3288_v29  ;;  %v1534_v33 = vmul.f32 %v1517_v55, %v1456_v34  ;;  %v1521_v57 = vsub.f32 1.0, %v1520_v51  ;;  %v1489_v0 = vsel %vm1488_vm0, %v2935_v23, %v1485_v56  ;;  %v1457_v29 = vld [vmem:[%s3314_s14 + $0x8] sm:$0xff]  ;;  %vm1526_vm6 = vmor %vm1524_vm5, %vm1525_vm4  ;;  %v2848_v23 = vld [vmem:[#allocation6 + $0xb0] sm:$0xff] }
 0x13c   : > { %v3344_v3 = vsel %vm1491_vm2, %v1493_v58, %v1489_v0  ;;  %vm1544_vm13 = vmor %vm1543_vm12, %vm1542_vm11  ;;  %1743 = vmatpush.bf16.msra.mxu2 %v2840_v20  ;;  %1946 = vmatpush.bf16.msrb.mxu3 %v2848_v23  ;;  %v2834_v34 = vld [vmem:[#allocation6 + $0x40] sm:$0xff]  ;;  %vm1585_vm0 = vcmask 64516   ;;  %vm1586_vm2 = vsmask.f32 7954  ;;  %v2852_v51 = vld [vmem:[#allocation6 + $0xd0] sm:$0xff] }
 0x13d   : > { %v3339_v61 = vadd.f32 %v1446_v10, %v1441_v52  ;;  %v1536_v1 = vpack.c.bf16 %v1534_v33, %v1534_v33  ;;  %v1522_v2 = vmul.f32 %v2937_v46, %v1521_v57  ;;  %v1978_v42 = vsub.f32 1.0, %v3344_v3  ;;  %1545 = vst.msk [vmem:[#allocation2 + $0x10] sm:$0x11] %vm1544_vm13, %v3080_v21  ;;  %v2837_v21 = vld [vmem:[#allocation6 + $0x58] sm:$0xff]  ;;  %1847 = vmatpush.bf16.msrb.mxu1 %v2834_v34  ;;  %vm3356_vm4 = vmand %vm1582_vm14, %vm1583_vm15  ;;  %v2828_v55 = vld [vmem:[#allocation6 + $0x10] sm:$0xff] }
 0x13e   : > { %1827 = vmatpush.bf16.msrb.mxu0 %v2832_v36  ;;  %vm3361_vm5 = vmand %vm1585_vm0, %vm1586_vm2  ;;  %v1589_v47 = vld [vmem:[#allocation2] sm:$0xff]  ;;  %vm1599_vm11 = vsmask.f32 4352  ;;  %v2827_v57 = vld [vmem:[#allocation6 + $0x8] sm:$0xff] }
 0x13f   : > { %v1550_v4 = vshrl.u32 %v1536_v1, 16  ;;  %v1523_v60 = vadd.f32 %v2937_v46, %v1522_v2  ;;  %v3348_v5 = vmul.f32 %v1978_v42, %v1457_v29  ;;  %v1553_v35 = vshll.u32 %v1536_v1, 16  ;;  %vm3371_vm12 = vmand %vm1596_vm9, %vm1546_vm8  ;;  %v2826_v2 = vld [vmem:[#allocation6] sm:$0xff] }
 0x140   : > { %1744 = vmatpush.bf16.msra.mxu2 %v2839_v24  ;;  %1947 = vmatpush.bf16.msrb.mxu3 %v2847_v26  ;;  %vm1594_vm2 = vmor %vm1585_vm0, %vm1582_vm14  ;;  %vm1737_vm8 = vcmask 130048  }
 0x141   : > { %v1552_v6 = vrot.slane %v1550_v4, 7  ;;  %v1527_v41 = vsel %vm1526_vm6, %v2937_v46, %v1523_v60  ;;  %vm1575_vm6 = vcmask 64512  }
 0x142   : > { %v1532_v59 = vsel %vm1529_vm7, %v1531_v30, %v1527_v41  ;;  %1828 = vmatpush.bf16.msrb.mxu0 %v2831_v39  ;;  %vm1588_vm7 = vmor %vm3361_vm5, %vm3356_vm4 }
 0x143   : > { %v1555_v8 = vor.u32 %v1553_v35, %v1552_v6  ;;  %v1535_v9 = vmul.f32 %v1532_v59, %v1457_v29  ;;  %v1556_v25 = vrot.slane %v1552_v6, 4 }
 0x144   : > { %1745 = vmatpush.bf16.msra.mxu2 %v2838_v22  ;;  %1948 = vmatpush.bf16.msrb.mxu3 %v2846_v32  ;;  %v1602_v62 = vld [vmem:[#allocation2 + $0x10] sm:$0x11] }
 0x145   : > { %1566 = vrot.lane.b32.xlu0 %v1555_v8, %s3081_s15  ;;  %v1537_v10 = vpack.c.bf16 %v1535_v9, %v1535_v9 }
 0x146   : > { %1829 = vmatpush.bf16.msrb.mxu0 %v2830_v53 }
 0x147   : > { %v1558_v7 = vshrl.u32 %v1537_v10, 16  ;;  %v1561_v11 = vshll.u32 %v1537_v10, 16 }
 0x148   : > { %1746 = vmatpush.bf16.msra.mxu2 %v2837_v21  ;;  %1949 = vmatpush.bf16.msrb.mxu3 %v2845_v37 }
 0x149   : > { %v1560_v13 = vrot.slane %v1558_v7, 7 }
 0x14a   : > { %1830 = vmatpush.bf16.msrb.mxu0 %v2829_v50 }
 0x14b   : > { %v1565_v12 = vrot.slane %v1560_v13, 4  ;;  %v1563_v14 = vor.u32 %v1561_v11, %v1560_v13 }
 0x14c   : > { %1747 = vmatpush.bf16.msra.mxu2 %v2836_v40  ;;  %1950 = vmatpush.bf16.msrb.mxu3 %v2844_v43 }
 0x14d   : > { %1570 = vrot.lane.b32.xlu1 %v1565_v12, %s3081_s15  ;;  %v1564_v15 = vsel %vm1548_vm10, %v1556_v25, %v1563_v14  ;;  %vm1598_vm10 = vcmask 61444  }
 0x14e   : > { %1568 = vrot.lane.b32.xlu0 %v1564_v15, %s3081_s15  ;;  %vm1600_vm13 = vmand %vm1598_vm10, %vm1599_vm11  ;;  %1831 = vmatpush.bf16.msrb.mxu0 %v2828_v55 }
 0x14f   : > { %vm1601_vm15 = vmor %vm1600_vm13, %vm3371_vm12 }
 0x150   : > { %1748 = vmatpush.bf16.msra.mxu2 %v2835_v44 }
 0x152   : > { %1832 = vmatpush.bf16.msrb.mxu0 %v2827_v57 }
 0x154   : > { %1964 = vmatpush.bf16.msrb.mxu2 %v2852_v51 }
 0x156   : > { %1833 = vmatpush.bf16.msrb.mxu0 %v2826_v2 }
 0x1b7   : > { %v1567_v46 = vpop.permute.xlu0 %1566 }
 0x1b8   : > { %v1572_v49 = vrot.slane %v1567_v46, 4 }
 0x1ba   : > { %v1576_v52 = vsel %vm1575_vm6, %v1572_v49, %v1567_v46 }
 0x1bb   : > { %v1590_v56 = vsel %vm1588_vm7, %v1576_v52, %v1589_v47 }
 0x1bc   : > { %1591 = vst [vmem:[#allocation2] sm:$0xff] %v1590_v56  ;;  %v1649_v35 = vunpack.c.h.b16 %v1590_v56  ;;  %v1648_v9 = vunpack.c.l.b16 %v1590_v56 }
 0x1bf   : > { %v1571_v58 = vpop.permute.xlu1 %1570 }
 0x1c0   : > { %v1574_v63 = vrot.slane %v1571_v58, 4  ;;  %v1569_v0 = vpop.permute.xlu0 %1568 }
 0x1c1   : > { %v1573_v1 = vrot.slane %v1569_v0, 4 }
 0x1c2   : > { %v1578_v29 = vsel %vm1575_vm6, %v1574_v63, %v1571_v58 }
 0x1c3   : > { %v1603_v42 = vsel %vm1601_vm15, %v1578_v29, %v1602_v62  ;;  %v1577_v4 = vsel %vm1575_vm6, %v1573_v1, %v1569_v0  ;;  %v1854_v60 = vld [vmem:[#allocation2] sm:$0xee] }
 0x1c4   : > { %1604 = vst [vmem:[#allocation2 + $0x10] sm:$0x11] %v1603_v42  ;;  %v1875_v7 = vunpack.c.l.b16 %v1854_v60  ;;  %v1876_v39 = vunpack.c.h.b16 %v1854_v60 }
 0x1c5   : > { %1595 = vst.msk [vmem:[#allocation2 + $0x8] sm:$0xff] %vm1594_vm2, %v1577_v4 }
 0x1cb   : > { %v1625_v30 = vld [vmem:[#allocation2 + $0x10] sm:$0x11] }
 0x1cc   : > { %v1606_v6 = vld [vmem:[#allocation2 + $0x8] sm:$0xff]  ;;  %v1652_v41 = vunpack.c.l.b16 %v1625_v30  ;;  %v1653_v59 = vunpack.c.h.b16 %v1625_v30 }
 0x1cd   : > { %v1651_v8 = vunpack.c.h.b16 %v1606_v6  ;;  %v1650_v10 = vunpack.c.l.b16 %v1606_v6 }
 0x1ce   : > { %v1656_v13 = vpack.c.b16 %v1652_v41, %v1652_v41  ;;  %v1657_v11 = vpack.c.b16 %v1653_v59, %v1653_v59 }
 0x1cf   : > { %v1655_v25 = vpack.c.b16 %v1651_v8, %v1649_v35  ;;  %v1654_v12 = vpack.c.b16 %v1650_v10, %v1648_v9  ;;  %v1877_v14 = vpack.c.b16 %v1650_v10, %v1875_v7  ;;  %v1878_v40 = vpack.c.b16 %v1651_v8, %v1876_v39 }
 0x1d0   : > { %v1880_v15 = vrot.slane %v1656_v13, 1  ;;  %v1666_v18 = vshll.u32 %v1656_v13, 16  ;;  %v1678_v20 = vshll.u32 %v1657_v11, 16  ;;  %v1883_v44 = vrot.slane %v1657_v11, 1 }
 0x1d1   : > { %2665 = vmatmul.msk.bf16.vlgmr.msrb.gmra.mxu1 %vm1737_vm8, %v1655_v25  ;;  %v1879_v16 = vrot.slane %v1877_v14, 1  ;;  %v1661_v17 = vshll.u32 %v1654_v12, 16  ;;  %v1673_v19 = vshll.u32 %v1655_v25, 16  ;;  %v1659_v24 = vshrl.u32 %v1654_v12, 16 }
 0x1d2   : > { %v1671_v27 = vshrl.u32 %v1655_v25, 16  ;;  %v1668_v32 = vrot.slane %v1666_v18, 1  ;;  %v1680_v36 = vrot.slane %v1678_v20, 1  ;;  %v1882_v43 = vrot.slane %v1878_v40, 1 }
 0x1d3   : > { %v1881_v23 = vsel %vm1116_vm3, %v1879_v16, %v1880_v15  ;;  %v1663_v26 = vrot.slane %v1661_v17, 1  ;;  %v1675_v22 = vrot.slane %v1673_v19, 1 }
 0x1d4   : > { %1951 = vmatmul.bf16.vlgmr.msrb.gmra.mxu3 %v1881_v23  ;;  %v1884_v53 = vsel %vm1116_vm3, %v1882_v43, %v1883_v44 }
 0x1d5   : > { %v1664_v31 = vor.u32 %v1663_v26, %v1659_v24  ;;  %v1676_v34 = vor.u32 %v1675_v22, %v1671_v27 }
 0x1d7   : > { %v1669_v21 = vsel %vm403_vm1, %v1664_v31, %v1668_v32  ;;  %v1681_v37 = vsel %vm403_vm1, %v1676_v34, %v1680_v36 }
 0x1d8   : > { %1749 = vmatmul.bf16.vlgmr.msra.gmra.mxu2 %v1669_v21  ;;  %2628 = vmatmul.msk.bf16.vlgmr.msra.gmra.mxu0 %vm1737_vm8, %v1681_v37 }
 0x1e8   : > { %2702 = vmatmul.msk.bf16.vlgmr.msrb.gmra.mxu2 %vm1737_vm8, %v1884_v53  ;;  %1834 = vmatmul.bf16.vlgmr.msrb.gmra.mxu0 %v1654_v12 }
 0x24e   : > { %v1849_v51 = vpop.f32.mrf.mxu1 }
 0x255   : > { %v1764_v45 = vpop.f32.mrf.mxu0 }
 0x256   : > { %v1851_v29 = vpop.f32.mrf.mxu1 }
 0x257   : > { %v1952_v55 = vpop.f32.mrf.mxu3 }
 0x25b   : > { %v1750_v54 = vpop.f32.mrf.mxu2 }
 0x25c   : > { %v1765_v49 = vadd.f32 %v1764_v45, %v1750_v54 }
 0x25d   : > { %v1766_v46 = vpop.f32.mrf.mxu0 }
 0x25f   : > { %v1954_v2 = vpop.f32.mrf.mxu3 }
 0x263   : > { %v1752_v47 = vpop.f32.mrf.mxu2 }
 0x264   : > { %v1767_v58 = vadd.f32 %v1766_v46, %v1752_v47 }
 0x265   : > { %v1835_v50 = vpop.f32.mrf.mxu0 }
 0x266   : > { %v1836_v52 = vadd.f32 %v1835_v50, %v1765_v49 }
 0x268   : > { %v1850_v33 = vadd.f32 %v1849_v51, %v1836_v52 }
 0x26b   : > { %v1966_v56 = vpop.f32.mrf.mxu2 }
 0x26c   : > { %v1967_v57 = vadd.f32 %v1966_v56, %v1952_v55 }
 0x26d   : > { %v1837_v63 = vpop.f32.mrf.mxu0 }
 0x26e   : > { %v1971_v62 = vadd.f32 %v1967_v57, %v1850_v33  ;;  %v1838_v1 = vadd.f32 %v1837_v63, %v1767_v58 }
 0x270   : > { %v1973_v0 = vadd.f32 %v1971_v62, %v3322_v28  ;;  %v1852_v4 = vadd.f32 %v1851_v29, %v1838_v1 }
 0x272   : > { %2938 = vtanh.f32 %v1973_v0 }
 0x273   : > { %v1968_v42 = vpop.f32.mrf.mxu2 }
 0x274   : > { %v1969_v60 = vadd.f32 %v1968_v42, %v1954_v2 }
 0x276   : > { %v1972_v30 = vadd.f32 %v1969_v60, %v1852_v4 }
 0x278   : > { %v2939_v6 = vpop.eup %2938  ;;  %v1974_v35 = vadd.f32 %v1972_v30, %v3339_v61 }
 0x279   : > { %v1981_v41 = vmul.f32 %v2939_v6, %v3326_v38 }
 0x27a   : > { %2940 = vtanh.f32 %v1974_v35 }
 0x27b   : > { %v1983_v59 = vadd.f32 %v1981_v41, %v3332_v48 }
 0x27d   : > { %1985 = vst [vmem:[%s266_s25] sm:$0xff] %v1983_v59 }
 0x280   : > { %v2941_v28 = vpop.eup %2940 }
 0x281   : > { %v1982_v8 = vmul.f32 %v2941_v28, %v3344_v3 }
 0x283   : > { %v1984_v61 = vadd.f32 %v1982_v8, %v3348_v5 }
 0x285   : > { %1986 = vst [vmem:[%s266_s25 + $0x8] sm:$0xff] %v1984_v61 }
 0x286   : > { %3029 = shalt.err (!%p3026_p8)
}
 0x287   : > { %s3082_s16 = smov 128  }
 0x288   : > { %2863 = dma.vmem_to_hbm [thread:$0]  (%p3151_p5), %s2001_s7, 256, %s2003_s8, %s1988_s22, %s3082_s16, %s3082_s16, %s3081_s15  }
 0x289 PF: > { %p2880_p9 = scmp.ge.s32.totalorder %s3072_s21, 2  ;;  %s2017_s23 = sand.u32 1, %s3060_s18  }
 0x28a   : > { %s2018_s25 = scalar_lea.sflag [#allocation5], %s2017_s23 }
 0x28b   : > { %p2873_p10 = pnand %p2880_p9, %p3155_p6 }
 0x28d   : > { %p2874_p11 = pneg %p2873_p10 }
 0x28f   : > { %3055 = dma.done.wait (%p2874_p11), %s2018_s25, 256  }
 0x290   : > { %3057 = vsyncadd (%p2874_p11), %s2018_s25, 4294967040  ;;  %p17_p12 = scmp.ge.s32.totalorder %s3138_s24, 4   ;;  %s3442_s18 = smov %s3064_s19 }
 0x291   : > { %s3443_s19 = smov %s3068_s20  ;;  %s3444_s20 = smov %s3149_s27 }
 0x292   : > { %s3445_s21 = smov %s3138_s24  ;;  %19 = sbr.rel (!%p17_p12) target bundleno = 5 (0x5), region = 91 }
 0x297   :  { %2024 = vsyncpa [#allocation4], 1 }
 0x298   :  { %2026 = vsyncpa [#allocation4 + $0x1], 1 }
 0x299   :  { %2027 = vsyncpa [#allocation7], 1 }
 0x29a   :  { %2028 = vsyncpa [#allocation5], 1 }
 0x29b   :  { %2030 = vsyncpa [#allocation5 + $0x1], 1 }

</bundles_post_ra>
